<compile_context>
chip_gen: v6e
topology: v6e:2x2x1
jax: 0.10.0
libtpu: 0.0.40
codegen_flags: <defaults>
</compile_context>

<pallas_src>
import functools

import jax
import jax.numpy as jnp
from jax import lax
from jax.experimental import pallas as pl
from jax.experimental.pallas import tpu as pltpu


# -----------------------------------------------------------------------------
# Pallas kernel
# -----------------------------------------------------------------------------
def _char_denoiser_kernel(
    x_ref,        # (T*B, I)     time-major rows (row = t*B + b)
    wih_ref,      # (I, 8H)      [fwd 4H | bwd 4H], gate order i,f,g,o
    bias_ref,     # (1, 8H)      b_ih + b_hh for both directions
    whh_f_ref,    # (H, 4H)
    whh_b_ref,    # (H, 4H)
    whead_ref,    # (2*T*H, O+1) fused linear + classifier head (permuted rows)
    bhead_ref,    # (1, O+1)
    out_ref,      # (B, O+1)
    gin_ref,      # VMEM scratch (T*B, 8H): pre-computed input gates
    *,
    T: int,
    B: int,
    H: int,
    O: int,
):
    # ---- (1) hoisted input projection for BOTH directions, one big matmul ----
    gin_ref[...] = (
        jnp.dot(x_ref[...], wih_ref[...], preferred_element_type=jnp.float32)
        + bias_ref[...]
    )

    # ---- (6) only the recurrent weights live in registers --------------------
    whh_f = whh_f_ref[...]
    whh_b = whh_b_ref[...]

    def cell(g_in, h, c, w_hh):
        gates = g_in + jnp.dot(h, w_hh, preferred_element_type=jnp.float32)
        # (4) one sigmoid pass over the full (B, 4H) vreg, slice i/f/o from it.
        sg = jax.nn.sigmoid(gates)
        i = sg[:, 0:H]
        f = sg[:, H:2 * H]
        o = sg[:, 3 * H:4 * H]
        g = jnp.tanh(gates[:, 2 * H:3 * H])
        c_new = f * c + i * g
        h_new = o * jnp.tanh(c_new)
        return h_new, c_new

    zeros = jnp.zeros((B, H), jnp.float32)
    h_f, c_f = zeros, zeros
    h_b, c_b = zeros, zeros
    hs_f = []
    hs_b = []

    # ---- (2)(3) merged + fully unrolled recurrence ---------------------------
    for t in range(T):
        gf = gin_ref[pl.ds(t * B, B), pl.ds(0, 4 * H)]                 # (B, 4H)
        gb = gin_ref[pl.ds((T - 1 - t) * B, B), pl.ds(4 * H, 4 * H)]   # (B, 4H)
        h_f, c_f = cell(gf, h_f, c_f, whh_f)
        h_b, c_b = cell(gb, h_b, c_b, whh_b)
        hs_f.append(h_f)
        hs_b.append(h_b)

    # ---- (5) deferred heads: single (B, 2TH) @ (2TH, O+1) matmul -------------
    # hs_b[s] is the backward hidden for time T-1-s; reverse so columns are
    # ordered [fwd t=0..T-1 | bwd t=0..T-1], matching the permuted head weight.
    hcat = jnp.concatenate(hs_f + hs_b[::-1], axis=1)                  # (B, 2TH)
    pc = (
        jnp.dot(hcat, whead_ref[...], preferred_element_type=jnp.float32)
        + bhead_ref[...]
    )                                                                  # (B, O+1)

    pred = pc[:, 0:O]
    cls = pc[:, O:O + 1]

    # softmax over dim=1, sigmoid on classification, concat.
    m = jnp.max(pred, axis=1, keepdims=True)
    e = jnp.exp(pred - m)
    denom = jnp.sum(e, axis=1, keepdims=True)
    sm = e * pl.reciprocal(denom, approx=True)       # (7) EUP reciprocal
    sg_cls = jax.nn.sigmoid(cls)

    out_ref[...] = jnp.concatenate([sm, sg_cls], axis=-1)              # (B, O+1)


# -----------------------------------------------------------------------------
# Wrapper: parameter reshaping + pallas_call
# -----------------------------------------------------------------------------
def char_denoiser_forward(x, params, *, seq_length, hidden_size, input_size):
    """x: (B, T, I) float32 (PyTorch batch-first layout). Returns (B, I + 1)."""
    B, T, I = x.shape
    H, O = hidden_size, input_size
    assert T == seq_length and I == input_size

    # LSTM input weights, both directions fused: (I, 8H); biases fused: (1, 8H).
    wih_cat = jnp.concatenate(
        [params["w_ih_f"].T, params["w_ih_b"].T], axis=1).astype(jnp.float32)
    b_cat = jnp.concatenate(
        [params["b_ih_f"] + params["b_hh_f"],
         params["b_ih_b"] + params["b_hh_b"]]).reshape(1, 8 * H).astype(jnp.float32)

    whh_f = params["w_hh_f"].T.astype(jnp.float32)                   # (H, 4H)
    whh_b = params["w_hh_b"].T.astype(jnp.float32)                   # (H, 4H)

    # Heads: PyTorch flat layout is k = t*2H + dir*H + h.  Permute rows to the
    # kernel's [dir, t, h] column ordering and fuse linear + classifier.
    def permute_head(w):                        # w: (out, T*2H) -> (2*T*H, out)
        out_dim = w.shape[0]
        w4 = w.reshape(out_dim, T, 2, H)
        return jnp.transpose(w4, (2, 1, 3, 0)).reshape(2 * T * H, out_dim)

    whead = jnp.concatenate(
        [permute_head(params["w_lin"]), permute_head(params["w_cls"])],
        axis=1).astype(jnp.float32)                                   # (2TH, O+1)
    bhead = jnp.concatenate(
        [params["b_lin"], params["b_cls"]]).reshape(1, O + 1).astype(jnp.float32)

    # Time-major flattened input: row index = t*B + b.
    x_2d = jnp.transpose(x, (1, 0, 2)).reshape(T * B, I).astype(jnp.float32)

    kernel = functools.partial(_char_denoiser_kernel, T=T, B=B, H=H, O=O)
    vmem = pl.BlockSpec(memory_space=pltpu.MemorySpace.VMEM)

    return pl.pallas_call(
        kernel,
        out_shape=jax.ShapeDtypeStruct((B, O + 1), jnp.float32),
        in_specs=[vmem] * 7,
        out_specs=vmem,
        scratch_shapes=[pltpu.VMEM((T * B, 8 * H), jnp.float32)],
    )(x_2d, wih_cat, b_cat, whh_f, whh_b, whead, bhead)


# -----------------------------------------------------------------------------
# Pure-JAX reference (mirrors the PyTorch forward) for verification
# -----------------------------------------------------------------------------
def _reference_forward(x, params, *, hidden_size):
    H = hidden_size
    B = x.shape[0]

    def run_dir(w_ih, w_hh, b_ih, b_hh, reverse):
        def step(carry, x_t):
            h, c = carry
            gates = x_t @ w_ih.T + h @ w_hh.T + b_ih + b_hh
            i = jax.nn.sigmoid(gates[:, :H])
            f = jax.nn.sigmoid(gates[:, H:2 * H])
            g = jnp.tanh(gates[:, 2 * H:3 * H])
            o = jax.nn.sigmoid(gates[:, 3 * H:])
            c = f * c + i * g
            h = o * jnp.tanh(c)
            return (h, c), h

        xs = jnp.transpose(x, (1, 0, 2))
        if reverse:
            xs = xs[::-1]
        _, hs = lax.scan(step, (jnp.zeros((B, H)), jnp.zeros((B, H))), xs)
        if reverse:
            hs = hs[::-1]
        return jnp.transpose(hs, (1, 0, 2))              # (B, T, H)

    out_f = run_dir(params["w_ih_f"], params["w_hh_f"],
                    params["b_ih_f"], params["b_hh_f"], reverse=False)
    out_b = run_dir(params["w_ih_b"], params["w_hh_b"],
                    params["b_ih_b"], params["b_hh_b"], reverse=True)
    lstm_out = jnp.concatenate([out_f, out_b], axis=-1)  # (B, T, 2H)
    flat = lstm_out.reshape(B, -1)
    pred = flat @ params["w_lin"].T + params["b_lin"]
    cls = flat @ params["w_cls"].T + params["b_cls"]
    return jnp.concatenate([jax.nn.softmax(pred, axis=1),
                            jax.nn.sigmoid(cls)], axis=1)


# -----------------------------------------------------------------------------
# Main
# -----------------------------------------------------------------------------
if __name__ == "__main__":
    # Small, forward-consistent shapes.
    batch_size = 8
    seq_length = 8
    hidden_size = 32
    input_size = 27
    H, T, O = hidden_size, seq_length, input_size

    key = jax.random.PRNGKey(0)
    keys = jax.random.split(key, 16)

    def unif(k, shape, scale):
        return jax.random.uniform(k, shape, jnp.float32, -scale, scale)

    s_lstm = 1.0 / jnp.sqrt(H)
    s_head = 1.0 / jnp.sqrt(T * 2 * H)

    params = {
        # forward-direction LSTM (PyTorch layout, gate order i,f,g,o)
        "w_ih_f": unif(keys[0], (4 * H, input_size), s_lstm),
        "w_hh_f": unif(keys[1], (4 * H, H), s_lstm),
        "b_ih_f": unif(keys[2], (4 * H,), s_lstm),
        "b_hh_f": unif(keys[3], (4 * H,), s_lstm),
        # backward-direction LSTM
        "w_ih_b": unif(keys[4], (4 * H, input_size), s_lstm),
        "w_hh_b": unif(keys[5], (4 * H, H), s_lstm),
        "b_ih_b": unif(keys[6], (4 * H,), s_lstm),
        "b_hh_b": unif(keys[7], (4 * H,), s_lstm),
        # linear head (out=input_size) and classifier head (out=1)
        "w_lin": unif(keys[8], (O, T * 2 * H), s_head),
        "b_lin": unif(keys[9], (O,), s_head),
        "w_cls": unif(keys[10], (1, T * 2 * H), s_head),
        "b_cls": unif(keys[11], (1,), s_head),
    }

    x = jax.random.normal(keys[12], (batch_size, seq_length, input_size),
                          dtype=jnp.float32)

    out = char_denoiser_forward(
        x, params, seq_length=T, hidden_size=H, input_size=O)
    out = jax.block_until_ready(out)

    ref = _reference_forward(x, params, hidden_size=H)
    assert out.shape == (batch_size, input_size + 1)
    # Slightly relaxed vs. pure-f32 because of the approx EUP reciprocal in the
    # softmax normalization; everything else is exact-f32.
    assert jnp.allclose(out, ref, rtol=1e-3, atol=1e-4), (
        float(jnp.max(jnp.abs(out - ref))))

    print("KERNEL_OK")
</pallas_src>

<mosaic_0001>
module attributes {stable_mosaic.version = 11 : i64} {
  func.func @_char_denoiser_kernel(%arg0: memref<64x27xf32, #tpu.memory_space<vmem>>, %arg1: memref<27x256xf32, #tpu.memory_space<vmem>>, %arg2: memref<1x256xf32, #tpu.memory_space<vmem>>, %arg3: memref<32x128xf32, #tpu.memory_space<vmem>>, %arg4: memref<32x128xf32, #tpu.memory_space<vmem>>, %arg5: memref<512x28xf32, #tpu.memory_space<vmem>>, %arg6: memref<1x28xf32, #tpu.memory_space<vmem>>, %arg7: memref<8x28xf32, #tpu.memory_space<vmem>>, %arg8: memref<64x256xf32, #tpu.memory_space<vmem>>) attributes {dimension_semantics = [], scalar_prefetch = 0 : i64, scratch_operands = 1 : i64, tpu.core_type = #tpu.core_type<tc>} {
    %c0 = arith.constant 0 : index
    %c0_0 = arith.constant 0 : index
    %0 = vector.load %arg0[%c0, %c0_0] : memref<64x27xf32, #tpu.memory_space<vmem>>, vector<64x27xf32>
    %c0_1 = arith.constant 0 : index
    %c0_2 = arith.constant 0 : index
    %1 = vector.load %arg1[%c0_1, %c0_2] : memref<27x256xf32, #tpu.memory_space<vmem>>, vector<27x256xf32>
    %cst = arith.constant dense<0.000000e+00> : vector<64x256xf32>
    %2 = tpu.matmul %0, %1, %cst {dimension_numbers = #tpu.dot_dimension_numbers<[1], [0], [0], [1], [0, 0, 1, 1], [], []>} : vector<64x27xf32>, vector<27x256xf32>, vector<64x256xf32> -> vector<64x256xf32>
    %c0_3 = arith.constant 0 : index
    %c0_4 = arith.constant 0 : index
    %3 = vector.load %arg2[%c0_3, %c0_4] : memref<1x256xf32, #tpu.memory_space<vmem>>, vector<1x256xf32>
    %4 = vector.broadcast %3 : vector<1x256xf32> to vector<64x256xf32>
    %5 = arith.addf %2, %4 : vector<64x256xf32>
    %c0_5 = arith.constant 0 : index
    %c0_6 = arith.constant 0 : index
    %6 = vector.load %arg8[%c0_5, %c0_6] : memref<64x256xf32, #tpu.memory_space<vmem>>, vector<64x256xf32>
    tpu.vector_store %arg8[%c0_5, %c0_6], %5 {strides = array<i32>} : memref<64x256xf32, #tpu.memory_space<vmem>>, vector<64x256xf32>,
    %c0_7 = arith.constant 0 : index
    %c0_8 = arith.constant 0 : index
    %7 = vector.load %arg3[%c0_7, %c0_8] : memref<32x128xf32, #tpu.memory_space<vmem>>, vector<32x128xf32>
    %c0_9 = arith.constant 0 : index
    %c0_10 = arith.constant 0 : index
    %8 = vector.load %arg4[%c0_9, %c0_10] : memref<32x128xf32, #tpu.memory_space<vmem>>, vector<32x128xf32>
    %cst_11 = arith.constant 0.000000e+00 : f32
    %9 = vector.broadcast %cst_11 : f32 to vector<8x32xf32>
    %c0_12 = arith.constant 0 : index
    %c0_13 = arith.constant 0 : index
    %10 = vector.load %arg8[%c0_12, %c0_13] : memref<64x256xf32, #tpu.memory_space<vmem>>, vector<8x128xf32>
    %c56 = arith.constant 56 : index
    %c128 = arith.constant 128 : index
    %11 = vector.load %arg8[%c56, %c128] : memref<64x256xf32, #tpu.memory_space<vmem>>, vector<8x128xf32>
    %cst_14 = arith.constant dense<0.000000e+00> : vector<8x128xf32>
    %12 = tpu.matmul %9, %7, %cst_14 {dimension_numbers = #tpu.dot_dimension_numbers<[1], [0], [0], [1], [0, 0, 1, 1], [], []>} : vector<8x32xf32>, vector<32x128xf32>, vector<8x128xf32> -> vector<8x128xf32>
    %13 = arith.addf %10, %12 : vector<8x128xf32>
    %14 = arith.negf %13 : vector<8x128xf32>
    %15 = math.exp %14 : vector<8x128xf32>
    %cst_15 = arith.constant 1.000000e+00 : f32
    %16 = vector.broadcast %cst_15 : f32 to vector<8x128xf32>
    %17 = arith.addf %16, %15 : vector<8x128xf32>
    %18 = arith.divf %16, %17 : vector<8x128xf32>
    %19 = vector.extract_strided_slice %18 {offsets = [0, 0], sizes = [8, 32], strides = [1, 1]} : vector<8x128xf32> to vector<8x32xf32>
    %20 = vector.extract_strided_slice %18 {offsets = [0, 32], sizes = [8, 32], strides = [1, 1]} : vector<8x128xf32> to vector<8x32xf32>
    %21 = vector.extract_strided_slice %18 {offsets = [0, 96], sizes = [8, 32], strides = [1, 1]} : vector<8x128xf32> to vector<8x32xf32>
    %22 = vector.extract_strided_slice %13 {offsets = [0, 64], sizes = [8, 32], strides = [1, 1]} : vector<8x128xf32> to vector<8x32xf32>
    %23 = math.tanh %22 : vector<8x32xf32>
    %24 = arith.mulf %20, %9 : vector<8x32xf32>
    %25 = arith.mulf %19, %23 : vector<8x32xf32>
    %26 = arith.addf %24, %25 : vector<8x32xf32>
    %27 = math.tanh %26 : vector<8x32xf32>
    %28 = arith.mulf %21, %27 : vector<8x32xf32>
    %cst_16 = arith.constant dense<0.000000e+00> : vector<8x128xf32>
    %29 = tpu.matmul %9, %8, %cst_16 {dimension_numbers = #tpu.dot_dimension_numbers<[1], [0], [0], [1], [0, 0, 1, 1], [], []>} : vector<8x32xf32>, vector<32x128xf32>, vector<8x128xf32> -> vector<8x128xf32>
    %30 = arith.addf %11, %29 : vector<8x128xf32>
    %31 = arith.negf %30 : vector<8x128xf32>
    %32 = math.exp %31 : vector<8x128xf32>
    %cst_17 = arith.constant 1.000000e+00 : f32
    %33 = vector.broadcast %cst_17 : f32 to vector<8x128xf32>
    %34 = arith.addf %33, %32 : vector<8x128xf32>
    %35 = arith.divf %33, %34 : vector<8x128xf32>
    %36 = vector.extract_strided_slice %35 {offsets = [0, 0], sizes = [8, 32], strides = [1, 1]} : vector<8x128xf32> to vector<8x32xf32>
    %37 = vector.extract_strided_slice %35 {offsets = [0, 32], sizes = [8, 32], strides = [1, 1]} : vector<8x128xf32> to vector<8x32xf32>
    %38 = vector.extract_strided_slice %35 {offsets = [0, 96], sizes = [8, 32], strides = [1, 1]} : vector<8x128xf32> to vector<8x32xf32>
    %39 = vector.extract_strided_slice %30 {offsets = [0, 64], sizes = [8, 32], strides = [1, 1]} : vector<8x128xf32> to vector<8x32xf32>
    %40 = math.tanh %39 : vector<8x32xf32>
    %41 = arith.mulf %37, %9 : vector<8x32xf32>
    %42 = arith.mulf %36, %40 : vector<8x32xf32>
    %43 = arith.addf %41, %42 : vector<8x32xf32>
    %44 = math.tanh %43 : vector<8x32xf32>
    %45 = arith.mulf %38, %44 : vector<8x32xf32>
    %c8 = arith.constant 8 : index
    %c0_18 = arith.constant 0 : index
    %46 = vector.load %arg8[%c8, %c0_18] : memref<64x256xf32, #tpu.memory_space<vmem>>, vector<8x128xf32>
    %c48 = arith.constant 48 : index
    %c128_19 = arith.constant 128 : index
    %47 = vector.load %arg8[%c48, %c128_19] : memref<64x256xf32, #tpu.memory_space<vmem>>, vector<8x128xf32>
    %cst_20 = arith.constant dense<0.000000e+00> : vector<8x128xf32>
    %48 = tpu.matmul %28, %7, %cst_20 {dimension_numbers = #tpu.dot_dimension_numbers<[1], [0], [0], [1], [0, 0, 1, 1], [], []>} : vector<8x32xf32>, vector<32x128xf32>, vector<8x128xf32> -> vector<8x128xf32>
    %49 = arith.addf %46, %48 : vector<8x128xf32>
    %50 = arith.negf %49 : vector<8x128xf32>
    %51 = math.exp %50 : vector<8x128xf32>
    %cst_21 = arith.constant 1.000000e+00 : f32
    %52 = vector.broadcast %cst_21 : f32 to vector<8x128xf32>
    %53 = arith.addf %52, %51 : vector<8x128xf32>
    %54 = arith.divf %52, %53 : vector<8x128xf32>
    %55 = vector.extract_strided_slice %54 {offsets = [0, 0], sizes = [8, 32], strides = [1, 1]} : vector<8x128xf32> to vector<8x32xf32>
    %56 = vector.extract_strided_slice %54 {offsets = [0, 32], sizes = [8, 32], strides = [1, 1]} : vector<8x128xf32> to vector<8x32xf32>
    %57 = vector.extract_strided_slice %54 {offsets = [0, 96], sizes = [8, 32], strides = [1, 1]} : vector<8x128xf32> to vector<8x32xf32>
    %58 = vector.extract_strided_slice %49 {offsets = [0, 64], sizes = [8, 32], strides = [1, 1]} : vector<8x128xf32> to vector<8x32xf32>
    %59 = math.tanh %58 : vector<8x32xf32>
    %60 = arith.mulf %56, %26 : vector<8x32xf32>
    %61 = arith.mulf %55, %59 : vector<8x32xf32>
    %62 = arith.addf %60, %61 : vector<8x32xf32>
    %63 = math.tanh %62 : vector<8x32xf32>
    %64 = arith.mulf %57, %63 : vector<8x32xf32>
    %cst_22 = arith.constant dense<0.000000e+00> : vector<8x128xf32>
    %65 = tpu.matmul %45, %8, %cst_22 {dimension_numbers = #tpu.dot_dimension_numbers<[1], [0], [0], [1], [0, 0, 1, 1], [], []>} : vector<8x32xf32>, vector<32x128xf32>, vector<8x128xf32> -> vector<8x128xf32>
    %66 = arith.addf %47, %65 : vector<8x128xf32>
    %67 = arith.negf %66 : vector<8x128xf32>
    %68 = math.exp %67 : vector<8x128xf32>
    %cst_23 = arith.constant 1.000000e+00 : f32
    %69 = vector.broadcast %cst_23 : f32 to vector<8x128xf32>
    %70 = arith.addf %69, %68 : vector<8x128xf32>
    %71 = arith.divf %69, %70 : vector<8x128xf32>
    %72 = vector.extract_strided_slice %71 {offsets = [0, 0], sizes = [8, 32], strides = [1, 1]} : vector<8x128xf32> to vector<8x32xf32>
    %73 = vector.extract_strided_slice %71 {offsets = [0, 32], sizes = [8, 32], strides = [1, 1]} : vector<8x128xf32> to vector<8x32xf32>
    %74 = vector.extract_strided_slice %71 {offsets = [0, 96], sizes = [8, 32], strides = [1, 1]} : vector<8x128xf32> to vector<8x32xf32>
    %75 = vector.extract_strided_slice %66 {offsets = [0, 64], sizes = [8, 32], strides = [1, 1]} : vector<8x128xf32> to vector<8x32xf32>
    %76 = math.tanh %75 : vector<8x32xf32>
    %77 = arith.mulf %73, %43 : vector<8x32xf32>
    %78 = arith.mulf %72, %76 : vector<8x32xf32>
    %79 = arith.addf %77, %78 : vector<8x32xf32>
    %80 = math.tanh %79 : vector<8x32xf32>
    %81 = arith.mulf %74, %80 : vector<8x32xf32>
    %c16 = arith.constant 16 : index
    %c0_24 = arith.constant 0 : index
    %82 = vector.load %arg8[%c16, %c0_24] : memref<64x256xf32, #tpu.memory_space<vmem>>, vector<8x128xf32>
    %c40 = arith.constant 40 : index
    %c128_25 = arith.constant 128 : index
    %83 = vector.load %arg8[%c40, %c128_25] : memref<64x256xf32, #tpu.memory_space<vmem>>, vector<8x128xf32>
    %cst_26 = arith.constant dense<0.000000e+00> : vector<8x128xf32>
    %84 = tpu.matmul %64, %7, %cst_26 {dimension_numbers = #tpu.dot_dimension_numbers<[1], [0], [0], [1], [0, 0, 1, 1], [], []>} : vector<8x32xf32>, vector<32x128xf32>, vector<8x128xf32> -> vector<8x128xf32>
    %85 = arith.addf %82, %84 : vector<8x128xf32>
    %86 = arith.negf %85 : vector<8x128xf32>
    %87 = math.exp %86 : vector<8x128xf32>
    %cst_27 = arith.constant 1.000000e+00 : f32
    %88 = vector.broadcast %cst_27 : f32 to vector<8x128xf32>
    %89 = arith.addf %88, %87 : vector<8x128xf32>
    %90 = arith.divf %88, %89 : vector<8x128xf32>
    %91 = vector.extract_strided_slice %90 {offsets = [0, 0], sizes = [8, 32], strides = [1, 1]} : vector<8x128xf32> to vector<8x32xf32>
    %92 = vector.extract_strided_slice %90 {offsets = [0, 32], sizes = [8, 32], strides = [1, 1]} : vector<8x128xf32> to vector<8x32xf32>
    %93 = vector.extract_strided_slice %90 {offsets = [0, 96], sizes = [8, 32], strides = [1, 1]} : vector<8x128xf32> to vector<8x32xf32>
    %94 = vector.extract_strided_slice %85 {offsets = [0, 64], sizes = [8, 32], strides = [1, 1]} : vector<8x128xf32> to vector<8x32xf32>
    %95 = math.tanh %94 : vector<8x32xf32>
    %96 = arith.mulf %92, %62 : vector<8x32xf32>
    %97 = arith.mulf %91, %95 : vector<8x32xf32>
    %98 = arith.addf %96, %97 : vector<8x32xf32>
    %99 = math.tanh %98 : vector<8x32xf32>
    %100 = arith.mulf %93, %99 : vector<8x32xf32>
    %cst_28 = arith.constant dense<0.000000e+00> : vector<8x128xf32>
    %101 = tpu.matmul %81, %8, %cst_28 {dimension_numbers = #tpu.dot_dimension_numbers<[1], [0], [0], [1], [0, 0, 1, 1], [], []>} : vector<8x32xf32>, vector<32x128xf32>, vector<8x128xf32> -> vector<8x128xf32>
    %102 = arith.addf %83, %101 : vector<8x128xf32>
    %103 = arith.negf %102 : vector<8x128xf32>
    %104 = math.exp %103 : vector<8x128xf32>
    %cst_29 = arith.constant 1.000000e+00 : f32
    %105 = vector.broadcast %cst_29 : f32 to vector<8x128xf32>
    %106 = arith.addf %105, %104 : vector<8x128xf32>
    %107 = arith.divf %105, %106 : vector<8x128xf32>
    %108 = vector.extract_strided_slice %107 {offsets = [0, 0], sizes = [8, 32], strides = [1, 1]} : vector<8x128xf32> to vector<8x32xf32>
    %109 = vector.extract_strided_slice %107 {offsets = [0, 32], sizes = [8, 32], strides = [1, 1]} : vector<8x128xf32> to vector<8x32xf32>
    %110 = vector.extract_strided_slice %107 {offsets = [0, 96], sizes = [8, 32], strides = [1, 1]} : vector<8x128xf32> to vector<8x32xf32>
    %111 = vector.extract_strided_slice %102 {offsets = [0, 64], sizes = [8, 32], strides = [1, 1]} : vector<8x128xf32> to vector<8x32xf32>
    %112 = math.tanh %111 : vector<8x32xf32>
    %113 = arith.mulf %109, %79 : vector<8x32xf32>
    %114 = arith.mulf %108, %112 : vector<8x32xf32>
    %115 = arith.addf %113, %114 : vector<8x32xf32>
    %116 = math.tanh %115 : vector<8x32xf32>
    %117 = arith.mulf %110, %116 : vector<8x32xf32>
    %c24 = arith.constant 24 : index
    %c0_30 = arith.constant 0 : index
    %118 = vector.load %arg8[%c24, %c0_30] : memref<64x256xf32, #tpu.memory_space<vmem>>, vector<8x128xf32>
    %c32 = arith.constant 32 : index
    %c128_31 = arith.constant 128 : index
    %119 = vector.load %arg8[%c32, %c128_31] : memref<64x256xf32, #tpu.memory_space<vmem>>, vector<8x128xf32>
    %cst_32 = arith.constant dense<0.000000e+00> : vector<8x128xf32>
    %120 = tpu.matmul %100, %7, %cst_32 {dimension_numbers = #tpu.dot_dimension_numbers<[1], [0], [0], [1], [0, 0, 1, 1], [], []>} : vector<8x32xf32>, vector<32x128xf32>, vector<8x128xf32> -> vector<8x128xf32>
    %121 = arith.addf %118, %120 : vector<8x128xf32>
    %122 = arith.negf %121 : vector<8x128xf32>
    %123 = math.exp %122 : vector<8x128xf32>
    %cst_33 = arith.constant 1.000000e+00 : f32
    %124 = vector.broadcast %cst_33 : f32 to vector<8x128xf32>
    %125 = arith.addf %124, %123 : vector<8x128xf32>
    %126 = arith.divf %124, %125 : vector<8x128xf32>
    %127 = vector.extract_strided_slice %126 {offsets = [0, 0], sizes = [8, 32], strides = [1, 1]} : vector<8x128xf32> to vector<8x32xf32>
    %128 = vector.extract_strided_slice %126 {offsets = [0, 32], sizes = [8, 32], strides = [1, 1]} : vector<8x128xf32> to vector<8x32xf32>
    %129 = vector.extract_strided_slice %126 {offsets = [0, 96], sizes = [8, 32], strides = [1, 1]} : vector<8x128xf32> to vector<8x32xf32>
    %130 = vector.extract_strided_slice %121 {offsets = [0, 64], sizes = [8, 32], strides = [1, 1]} : vector<8x128xf32> to vector<8x32xf32>
    %131 = math.tanh %130 : vector<8x32xf32>
    %132 = arith.mulf %128, %98 : vector<8x32xf32>
    %133 = arith.mulf %127, %131 : vector<8x32xf32>
    %134 = arith.addf %132, %133 : vector<8x32xf32>
    %135 = math.tanh %134 : vector<8x32xf32>
    %136 = arith.mulf %129, %135 : vector<8x32xf32>
    %cst_34 = arith.constant dense<0.000000e+00> : vector<8x128xf32>
    %137 = tpu.matmul %117, %8, %cst_34 {dimension_numbers = #tpu.dot_dimension_numbers<[1], [0], [0], [1], [0, 0, 1, 1], [], []>} : vector<8x32xf32>, vector<32x128xf32>, vector<8x128xf32> -> vector<8x128xf32>
    %138 = arith.addf %119, %137 : vector<8x128xf32>
    %139 = arith.negf %138 : vector<8x128xf32>
    %140 = math.exp %139 : vector<8x128xf32>
    %cst_35 = arith.constant 1.000000e+00 : f32
    %141 = vector.broadcast %cst_35 : f32 to vector<8x128xf32>
    %142 = arith.addf %141, %140 : vector<8x128xf32>
    %143 = arith.divf %141, %142 : vector<8x128xf32>
    %144 = vector.extract_strided_slice %143 {offsets = [0, 0], sizes = [8, 32], strides = [1, 1]} : vector<8x128xf32> to vector<8x32xf32>
    %145 = vector.extract_strided_slice %143 {offsets = [0, 32], sizes = [8, 32], strides = [1, 1]} : vector<8x128xf32> to vector<8x32xf32>
    %146 = vector.extract_strided_slice %143 {offsets = [0, 96], sizes = [8, 32], strides = [1, 1]} : vector<8x128xf32> to vector<8x32xf32>
    %147 = vector.extract_strided_slice %138 {offsets = [0, 64], sizes = [8, 32], strides = [1, 1]} : vector<8x128xf32> to vector<8x32xf32>
    %148 = math.tanh %147 : vector<8x32xf32>
    %149 = arith.mulf %145, %115 : vector<8x32xf32>
    %150 = arith.mulf %144, %148 : vector<8x32xf32>
    %151 = arith.addf %149, %150 : vector<8x32xf32>
    %152 = math.tanh %151 : vector<8x32xf32>
    %153 = arith.mulf %146, %152 : vector<8x32xf32>
    %c32_36 = arith.constant 32 : index
    %c0_37 = arith.constant 0 : index
    %154 = vector.load %arg8[%c32_36, %c0_37] : memref<64x256xf32, #tpu.memory_space<vmem>>, vector<8x128xf32>
    %c24_38 = arith.constant 24 : index
    %c128_39 = arith.constant 128 : index
    %155 = vector.load %arg8[%c24_38, %c128_39] : memref<64x256xf32, #tpu.memory_space<vmem>>, vector<8x128xf32>
    %cst_40 = arith.constant dense<0.000000e+00> : vector<8x128xf32>
    %156 = tpu.matmul %136, %7, %cst_40 {dimension_numbers = #tpu.dot_dimension_numbers<[1], [0], [0], [1], [0, 0, 1, 1], [], []>} : vector<8x32xf32>, vector<32x128xf32>, vector<8x128xf32> -> vector<8x128xf32>
    %157 = arith.addf %154, %156 : vector<8x128xf32>
    %158 = arith.negf %157 : vector<8x128xf32>
    %159 = math.exp %158 : vector<8x128xf32>
    %cst_41 = arith.constant 1.000000e+00 : f32
    %160 = vector.broadcast %cst_41 : f32 to vector<8x128xf32>
    %161 = arith.addf %160, %159 : vector<8x128xf32>
    %162 = arith.divf %160, %161 : vector<8x128xf32>
    %163 = vector.extract_strided_slice %162 {offsets = [0, 0], sizes = [8, 32], strides = [1, 1]} : vector<8x128xf32> to vector<8x32xf32>
    %164 = vector.extract_strided_slice %162 {offsets = [0, 32], sizes = [8, 32], strides = [1, 1]} : vector<8x128xf32> to vector<8x32xf32>
    %165 = vector.extract_strided_slice %162 {offsets = [0, 96], sizes = [8, 32], strides = [1, 1]} : vector<8x128xf32> to vector<8x32xf32>
    %166 = vector.extract_strided_slice %157 {offsets = [0, 64], sizes = [8, 32], strides = [1, 1]} : vector<8x128xf32> to vector<8x32xf32>
    %167 = math.tanh %166 : vector<8x32xf32>
    %168 = arith.mulf %164, %134 : vector<8x32xf32>
    %169 = arith.mulf %163, %167 : vector<8x32xf32>
    %170 = arith.addf %168, %169 : vector<8x32xf32>
    %171 = math.tanh %170 : vector<8x32xf32>
    %172 = arith.mulf %165, %171 : vector<8x32xf32>
    %cst_42 = arith.constant dense<0.000000e+00> : vector<8x128xf32>
    %173 = tpu.matmul %153, %8, %cst_42 {dimension_numbers = #tpu.dot_dimension_numbers<[1], [0], [0], [1], [0, 0, 1, 1], [], []>} : vector<8x32xf32>, vector<32x128xf32>, vector<8x128xf32> -> vector<8x128xf32>
    %174 = arith.addf %155, %173 : vector<8x128xf32>
    %175 = arith.negf %174 : vector<8x128xf32>
    %176 = math.exp %175 : vector<8x128xf32>
    %cst_43 = arith.constant 1.000000e+00 : f32
    %177 = vector.broadcast %cst_43 : f32 to vector<8x128xf32>
    %178 = arith.addf %177, %176 : vector<8x128xf32>
    %179 = arith.divf %177, %178 : vector<8x128xf32>
    %180 = vector.extract_strided_slice %179 {offsets = [0, 0], sizes = [8, 32], strides = [1, 1]} : vector<8x128xf32> to vector<8x32xf32>
    %181 = vector.extract_strided_slice %179 {offsets = [0, 32], sizes = [8, 32], strides = [1, 1]} : vector<8x128xf32> to vector<8x32xf32>
    %182 = vector.extract_strided_slice %179 {offsets = [0, 96], sizes = [8, 32], strides = [1, 1]} : vector<8x128xf32> to vector<8x32xf32>
    %183 = vector.extract_strided_slice %174 {offsets = [0, 64], sizes = [8, 32], strides = [1, 1]} : vector<8x128xf32> to vector<8x32xf32>
    %184 = math.tanh %183 : vector<8x32xf32>
    %185 = arith.mulf %181, %151 : vector<8x32xf32>
    %186 = arith.mulf %180, %184 : vector<8x32xf32>
    %187 = arith.addf %185, %186 : vector<8x32xf32>
    %188 = math.tanh %187 : vector<8x32xf32>
    %189 = arith.mulf %182, %188 : vector<8x32xf32>
    %c40_44 = arith.constant 40 : index
    %c0_45 = arith.constant 0 : index
    %190 = vector.load %arg8[%c40_44, %c0_45] : memref<64x256xf32, #tpu.memory_space<vmem>>, vector<8x128xf32>
    %c16_46 = arith.constant 16 : index
    %c128_47 = arith.constant 128 : index
    %191 = vector.load %arg8[%c16_46, %c128_47] : memref<64x256xf32, #tpu.memory_space<vmem>>, vector<8x128xf32>
    %cst_48 = arith.constant dense<0.000000e+00> : vector<8x128xf32>
    %192 = tpu.matmul %172, %7, %cst_48 {dimension_numbers = #tpu.dot_dimension_numbers<[1], [0], [0], [1], [0, 0, 1, 1], [], []>} : vector<8x32xf32>, vector<32x128xf32>, vector<8x128xf32> -> vector<8x128xf32>
    %193 = arith.addf %190, %192 : vector<8x128xf32>
    %194 = arith.negf %193 : vector<8x128xf32>
    %195 = math.exp %194 : vector<8x128xf32>
    %cst_49 = arith.constant 1.000000e+00 : f32
    %196 = vector.broadcast %cst_49 : f32 to vector<8x128xf32>
    %197 = arith.addf %196, %195 : vector<8x128xf32>
    %198 = arith.divf %196, %197 : vector<8x128xf32>
    %199 = vector.extract_strided_slice %198 {offsets = [0, 0], sizes = [8, 32], strides = [1, 1]} : vector<8x128xf32> to vector<8x32xf32>
    %200 = vector.extract_strided_slice %198 {offsets = [0, 32], sizes = [8, 32], strides = [1, 1]} : vector<8x128xf32> to vector<8x32xf32>
    %201 = vector.extract_strided_slice %198 {offsets = [0, 96], sizes = [8, 32], strides = [1, 1]} : vector<8x128xf32> to vector<8x32xf32>
    %202 = vector.extract_strided_slice %193 {offsets = [0, 64], sizes = [8, 32], strides = [1, 1]} : vector<8x128xf32> to vector<8x32xf32>
    %203 = math.tanh %202 : vector<8x32xf32>
    %204 = arith.mulf %200, %170 : vector<8x32xf32>
    %205 = arith.mulf %199, %203 : vector<8x32xf32>
    %206 = arith.addf %204, %205 : vector<8x32xf32>
    %207 = math.tanh %206 : vector<8x32xf32>
    %208 = arith.mulf %201, %207 : vector<8x32xf32>
    %cst_50 = arith.constant dense<0.000000e+00> : vector<8x128xf32>
    %209 = tpu.matmul %189, %8, %cst_50 {dimension_numbers = #tpu.dot_dimension_numbers<[1], [0], [0], [1], [0, 0, 1, 1], [], []>} : vector<8x32xf32>, vector<32x128xf32>, vector<8x128xf32> -> vector<8x128xf32>
    %210 = arith.addf %191, %209 : vector<8x128xf32>
    %211 = arith.negf %210 : vector<8x128xf32>
    %212 = math.exp %211 : vector<8x128xf32>
    %cst_51 = arith.constant 1.000000e+00 : f32
    %213 = vector.broadcast %cst_51 : f32 to vector<8x128xf32>
    %214 = arith.addf %213, %212 : vector<8x128xf32>
    %215 = arith.divf %213, %214 : vector<8x128xf32>
    %216 = vector.extract_strided_slice %215 {offsets = [0, 0], sizes = [8, 32], strides = [1, 1]} : vector<8x128xf32> to vector<8x32xf32>
    %217 = vector.extract_strided_slice %215 {offsets = [0, 32], sizes = [8, 32], strides = [1, 1]} : vector<8x128xf32> to vector<8x32xf32>
    %218 = vector.extract_strided_slice %215 {offsets = [0, 96], sizes = [8, 32], strides = [1, 1]} : vector<8x128xf32> to vector<8x32xf32>
    %219 = vector.extract_strided_slice %210 {offsets = [0, 64], sizes = [8, 32], strides = [1, 1]} : vector<8x128xf32> to vector<8x32xf32>
    %220 = math.tanh %219 : vector<8x32xf32>
    %221 = arith.mulf %217, %187 : vector<8x32xf32>
    %222 = arith.mulf %216, %220 : vector<8x32xf32>
    %223 = arith.addf %221, %222 : vector<8x32xf32>
    %224 = math.tanh %223 : vector<8x32xf32>
    %225 = arith.mulf %218, %224 : vector<8x32xf32>
    %c48_52 = arith.constant 48 : index
    %c0_53 = arith.constant 0 : index
    %226 = vector.load %arg8[%c48_52, %c0_53] : memref<64x256xf32, #tpu.memory_space<vmem>>, vector<8x128xf32>
    %c8_54 = arith.constant 8 : index
    %c128_55 = arith.constant 128 : index
    %227 = vector.load %arg8[%c8_54, %c128_55] : memref<64x256xf32, #tpu.memory_space<vmem>>, vector<8x128xf32>
    %cst_56 = arith.constant dense<0.000000e+00> : vector<8x128xf32>
    %228 = tpu.matmul %208, %7, %cst_56 {dimension_numbers = #tpu.dot_dimension_numbers<[1], [0], [0], [1], [0, 0, 1, 1], [], []>} : vector<8x32xf32>, vector<32x128xf32>, vector<8x128xf32> -> vector<8x128xf32>
    %229 = arith.addf %226, %228 : vector<8x128xf32>
    %230 = arith.negf %229 : vector<8x128xf32>
    %231 = math.exp %230 : vector<8x128xf32>
    %cst_57 = arith.constant 1.000000e+00 : f32
    %232 = vector.broadcast %cst_57 : f32 to vector<8x128xf32>
    %233 = arith.addf %232, %231 : vector<8x128xf32>
    %234 = arith.divf %232, %233 : vector<8x128xf32>
    %235 = vector.extract_strided_slice %234 {offsets = [0, 0], sizes = [8, 32], strides = [1, 1]} : vector<8x128xf32> to vector<8x32xf32>
    %236 = vector.extract_strided_slice %234 {offsets = [0, 32], sizes = [8, 32], strides = [1, 1]} : vector<8x128xf32> to vector<8x32xf32>
    %237 = vector.extract_strided_slice %234 {offsets = [0, 96], sizes = [8, 32], strides = [1, 1]} : vector<8x128xf32> to vector<8x32xf32>
    %238 = vector.extract_strided_slice %229 {offsets = [0, 64], sizes = [8, 32], strides = [1, 1]} : vector<8x128xf32> to vector<8x32xf32>
    %239 = math.tanh %238 : vector<8x32xf32>
    %240 = arith.mulf %236, %206 : vector<8x32xf32>
    %241 = arith.mulf %235, %239 : vector<8x32xf32>
    %242 = arith.addf %240, %241 : vector<8x32xf32>
    %243 = math.tanh %242 : vector<8x32xf32>
    %244 = arith.mulf %237, %243 : vector<8x32xf32>
    %cst_58 = arith.constant dense<0.000000e+00> : vector<8x128xf32>
    %245 = tpu.matmul %225, %8, %cst_58 {dimension_numbers = #tpu.dot_dimension_numbers<[1], [0], [0], [1], [0, 0, 1, 1], [], []>} : vector<8x32xf32>, vector<32x128xf32>, vector<8x128xf32> -> vector<8x128xf32>
    %246 = arith.addf %227, %245 : vector<8x128xf32>
    %247 = arith.negf %246 : vector<8x128xf32>
    %248 = math.exp %247 : vector<8x128xf32>
    %cst_59 = arith.constant 1.000000e+00 : f32
    %249 = vector.broadcast %cst_59 : f32 to vector<8x128xf32>
    %250 = arith.addf %249, %248 : vector<8x128xf32>
    %251 = arith.divf %249, %250 : vector<8x128xf32>
    %252 = vector.extract_strided_slice %251 {offsets = [0, 0], sizes = [8, 32], strides = [1, 1]} : vector<8x128xf32> to vector<8x32xf32>
    %253 = vector.extract_strided_slice %251 {offsets = [0, 32], sizes = [8, 32], strides = [1, 1]} : vector<8x128xf32> to vector<8x32xf32>
    %254 = vector.extract_strided_slice %251 {offsets = [0, 96], sizes = [8, 32], strides = [1, 1]} : vector<8x128xf32> to vector<8x32xf32>
    %255 = vector.extract_strided_slice %246 {offsets = [0, 64], sizes = [8, 32], strides = [1, 1]} : vector<8x128xf32> to vector<8x32xf32>
    %256 = math.tanh %255 : vector<8x32xf32>
    %257 = arith.mulf %253, %223 : vector<8x32xf32>
    %258 = arith.mulf %252, %256 : vector<8x32xf32>
    %259 = arith.addf %257, %258 : vector<8x32xf32>
    %260 = math.tanh %259 : vector<8x32xf32>
    %261 = arith.mulf %254, %260 : vector<8x32xf32>
    %c56_60 = arith.constant 56 : index
    %c0_61 = arith.constant 0 : index
    %262 = vector.load %arg8[%c56_60, %c0_61] : memref<64x256xf32, #tpu.memory_space<vmem>>, vector<8x128xf32>
    %c0_62 = arith.constant 0 : index
    %c128_63 = arith.constant 128 : index
    %263 = vector.load %arg8[%c0_62, %c128_63] : memref<64x256xf32, #tpu.memory_space<vmem>>, vector<8x128xf32>
    %cst_64 = arith.constant dense<0.000000e+00> : vector<8x128xf32>
    %264 = tpu.matmul %244, %7, %cst_64 {dimension_numbers = #tpu.dot_dimension_numbers<[1], [0], [0], [1], [0, 0, 1, 1], [], []>} : vector<8x32xf32>, vector<32x128xf32>, vector<8x128xf32> -> vector<8x128xf32>
    %265 = arith.addf %262, %264 : vector<8x128xf32>
    %266 = arith.negf %265 : vector<8x128xf32>
    %267 = math.exp %266 : vector<8x128xf32>
    %cst_65 = arith.constant 1.000000e+00 : f32
    %268 = vector.broadcast %cst_65 : f32 to vector<8x128xf32>
    %269 = arith.addf %268, %267 : vector<8x128xf32>
    %270 = arith.divf %268, %269 : vector<8x128xf32>
    %271 = vector.extract_strided_slice %270 {offsets = [0, 0], sizes = [8, 32], strides = [1, 1]} : vector<8x128xf32> to vector<8x32xf32>
    %272 = vector.extract_strided_slice %270 {offsets = [0, 32], sizes = [8, 32], strides = [1, 1]} : vector<8x128xf32> to vector<8x32xf32>
    %273 = vector.extract_strided_slice %270 {offsets = [0, 96], sizes = [8, 32], strides = [1, 1]} : vector<8x128xf32> to vector<8x32xf32>
    %274 = vector.extract_strided_slice %265 {offsets = [0, 64], sizes = [8, 32], strides = [1, 1]} : vector<8x128xf32> to vector<8x32xf32>
    %275 = math.tanh %274 : vector<8x32xf32>
    %276 = arith.mulf %272, %242 : vector<8x32xf32>
    %277 = arith.mulf %271, %275 : vector<8x32xf32>
    %278 = arith.addf %276, %277 : vector<8x32xf32>
    %279 = math.tanh %278 : vector<8x32xf32>
    %280 = arith.mulf %273, %279 : vector<8x32xf32>
    %cst_66 = arith.constant dense<0.000000e+00> : vector<8x128xf32>
    %281 = tpu.matmul %261, %8, %cst_66 {dimension_numbers = #tpu.dot_dimension_numbers<[1], [0], [0], [1], [0, 0, 1, 1], [], []>} : vector<8x32xf32>, vector<32x128xf32>, vector<8x128xf32> -> vector<8x128xf32>
    %282 = arith.addf %263, %281 : vector<8x128xf32>
    %283 = arith.negf %282 : vector<8x128xf32>
    %284 = math.exp %283 : vector<8x128xf32>
    %cst_67 = arith.constant 1.000000e+00 : f32
    %285 = vector.broadcast %cst_67 : f32 to vector<8x128xf32>
    %286 = arith.addf %285, %284 : vector<8x128xf32>
    %287 = arith.divf %285, %286 : vector<8x128xf32>
    %288 = vector.extract_strided_slice %287 {offsets = [0, 0], sizes = [8, 32], strides = [1, 1]} : vector<8x128xf32> to vector<8x32xf32>
    %289 = vector.extract_strided_slice %287 {offsets = [0, 32], sizes = [8, 32], strides = [1, 1]} : vector<8x128xf32> to vector<8x32xf32>
    %290 = vector.extract_strided_slice %287 {offsets = [0, 96], sizes = [8, 32], strides = [1, 1]} : vector<8x128xf32> to vector<8x32xf32>
    %291 = vector.extract_strided_slice %282 {offsets = [0, 64], sizes = [8, 32], strides = [1, 1]} : vector<8x128xf32> to vector<8x32xf32>
    %292 = math.tanh %291 : vector<8x32xf32>
    %293 = arith.mulf %289, %259 : vector<8x32xf32>
    %294 = arith.mulf %288, %292 : vector<8x32xf32>
    %295 = arith.addf %293, %294 : vector<8x32xf32>
    %296 = math.tanh %295 : vector<8x32xf32>
    %297 = arith.mulf %290, %296 : vector<8x32xf32>
    %298 = tpu.concatenate %28, %64, %100, %136, %172, %208, %244, %280, %297, %261, %225, %189, %153, %117, %81, %45 in 1 : vector<8x32xf32>, vector<8x32xf32>, vector<8x32xf32>, vector<8x32xf32>, vector<8x32xf32>, vector<8x32xf32>, vector<8x32xf32>, vector<8x32xf32>, vector<8x32xf32>, vector<8x32xf32>, vector<8x32xf32>, vector<8x32xf32>, vector<8x32xf32>, vector<8x32xf32>, vector<8x32xf32>, vector<8x32xf32> -> vector<8x512xf32>
    %c0_68 = arith.constant 0 : index
    %c0_69 = arith.constant 0 : index
    %299 = vector.load %arg5[%c0_68, %c0_69] : memref<512x28xf32, #tpu.memory_space<vmem>>, vector<512x28xf32>
    %cst_70 = arith.constant dense<0.000000e+00> : vector<8x28xf32>
    %300 = tpu.matmul %298, %299, %cst_70 {dimension_numbers = #tpu.dot_dimension_numbers<[1], [0], [0], [1], [0, 0, 1, 1], [], []>} : vector<8x512xf32>, vector<512x28xf32>, vector<8x28xf32> -> vector<8x28xf32>
    %c0_71 = arith.constant 0 : index
    %c0_72 = arith.constant 0 : index
    %301 = vector.load %arg6[%c0_71, %c0_72] : memref<1x28xf32, #tpu.memory_space<vmem>>, vector<1x28xf32>
    %302 = vector.broadcast %301 : vector<1x28xf32> to vector<8x28xf32>
    %303 = arith.addf %300, %302 : vector<8x28xf32>
    %304 = vector.extract_strided_slice %303 {offsets = [0, 0], sizes = [8, 27], strides = [1, 1]} : vector<8x28xf32> to vector<8x27xf32>
    %305 = vector.extract_strided_slice %303 {offsets = [0, 27], sizes = [8, 1], strides = [1, 1]} : vector<8x28xf32> to vector<8x1xf32>
    %cst_73 = arith.constant dense<0xFF800000> : vector<8xf32>
    %306 = vector.multi_reduction <maximumf>, %304, %cst_73 [1] : vector<8x27xf32> to vector<8xf32>
    %307 = vector.shape_cast %306 : vector<8xf32> to vector<8x1xf32>
    %308 = vector.broadcast %307 : vector<8x1xf32> to vector<8x27xf32>
    %309 = arith.subf %304, %308 : vector<8x27xf32>
    %310 = math.exp %309 : vector<8x27xf32>
    %cst_74 = arith.constant dense<0.000000e+00> : vector<8xf32>
    %311 = vector.multi_reduction <add>, %310, %cst_74 [1] : vector<8x27xf32> to vector<8xf32>
    %312 = vector.shape_cast %311 : vector<8xf32> to vector<8x1xf32>
    %313 = tpu.reciprocal %312 {approx = true} : vector<8x1xf32> -> vector<8x1xf32>
    %314 = vector.broadcast %313 : vector<8x1xf32> to vector<8x27xf32>
    %315 = arith.mulf %310, %314 : vector<8x27xf32>
    %316 = arith.negf %305 : vector<8x1xf32>
    %317 = math.exp %316 : vector<8x1xf32>
    %cst_75 = arith.constant 1.000000e+00 : f32
    %318 = vector.broadcast %cst_75 : f32 to vector<8x1xf32>
    %319 = arith.addf %318, %317 : vector<8x1xf32>
    %320 = arith.divf %318, %319 : vector<8x1xf32>
    %321 = tpu.concatenate %315, %320 in 1 : vector<8x27xf32>, vector<8x1xf32> -> vector<8x28xf32>
    %c0_76 = arith.constant 0 : index
    %c0_77 = arith.constant 0 : index
    %322 = vector.load %arg7[%c0_76, %c0_77] : memref<8x28xf32, #tpu.memory_space<vmem>>, vector<8x28xf32>
    tpu.vector_store %arg7[%c0_76, %c0_77], %321 {strides = array<i32>} : memref<8x28xf32, #tpu.memory_space<vmem>>, vector<8x28xf32>,
    return
  }
}

</mosaic_0001>

<bundles_post_ra>
// kernel: tpu_custom_call.1
= control target key start
LH: loop header
LB: loop body
LE: loop exit
PB: predicated region body
PF: predicated region fallthrough
CT: control target
= control target key end

     0   :  { %vm80_vm0 = vcmask 1042432   ;;  %v2680_v5 = vmov 0.0   ;;  %vm55_vm1 = vcmask 220160   ;;  %s3457_s0 = inlined_call_operand.vmem [shape: f32[64,27], index: 0, kind: input, shape index: {}]   ;;  %s3458_s1 = inlined_call_operand.vmem [shape: f32[27,256], index: 1, kind: input, shape index: {}]   ;;  %s3459_s2 = inlined_call_operand.vmem [shape: f32[1,256], index: 2, kind: input, shape index: {}]   ;;  %s3460_s3 = inlined_call_operand.vmem [shape: f32[32,128], index: 3, kind: input, shape index: {}]   ;;  %s3461_s4 = inlined_call_operand.vmem [shape: f32[32,128], index: 4, kind: input, shape index: {}]   ;;  %s3462_s5 = inlined_call_operand.vmem [shape: f32[512,28], index: 5, kind: input, shape index: {}]   ;;  %s3463_s6 = inlined_call_operand.vmem [shape: f32[1,28], index: 6, kind: input, shape index: {}]   ;;  %s3464_s7 = inlined_call_operand.hbm [shape: f32[8,28], index: 7, kind: output, shape index: {}]  }
   0x1   :  { %v42_v0 = vld [vmem:[%s3458_s1 + $0x38] sm:$0x7]  ;;  %v41_v1 = vld [vmem:[%s3458_s1 + $0x30] sm:$0x7]  ;;  %v40_v2 = vld [vmem:[%s3458_s1 + $0x28] sm:$0xff]  ;;  %2316 = vmatprep.subr.mxu1 %v2680_v5  ;;  %151 = vmatprep.mubr.f32.mxu0 %v2680_v5 }
   0x2   :  { %2124 = vmatprep.subr.msk.mxu0 %vm80_vm0, %v42_v0  ;;  %v39_v3 = vld [vmem:[%s3458_s1 + $0x20] sm:$0xff]  ;;  %v2741_v4 = vld [vmem:[%s3460_s3 + $0x18] sm:$0xff]  ;;  %v2750_v7 = vld [vmem:[%s3460_s3 + $0x10] sm:$0xff] }
   0x3   :  { %2125 = vmatpush1.msk.msra.mxu0 %vm80_vm0, %v41_v1  ;;  %v38_v6 = vld [vmem:[%s3458_s1 + $0x18] sm:$0xff]  ;;  %2317 = vmatpush3.msra.mxu1 %v2741_v4  ;;  %v37_v8 = vld [vmem:[%s3458_s1 + $0x10] sm:$0xff]  ;;  %v36_v9 = vld [vmem:[%s3458_s1 + $0x8] sm:$0xff] }
   0x4   :  { %113 = vmatprep.subr.mxu0 %v40_v2  ;;  %2318 = vmatprep.subr.mxu1 %v2680_v5  ;;  %v35_v10 = vld [vmem:[%s3458_s1] sm:$0xff]  ;;  %v2767_v11 = vld [vmem:[%s3460_s3 + $0x8] sm:$0xff] }
   0x5   :  { %114 = vmatpush1.msra.mxu0 %v39_v3  ;;  %2319 = vmatpush3.msra.mxu1 %v2750_v7  ;;  %v27_v12 = vld [vmem:[%s3457_s0] sm:$0xff] }
   0x6   :  { %115 = vmatprep.subr.mxu0 %v38_v6  ;;  %2320 = vmatprep.subr.mxu1 %v2680_v5  ;;  %v2777_v13 = vld [vmem:[%s3460_s3] sm:$0xff] }
   0x7   :  { %116 = vmatpush1.msra.mxu0 %v37_v8  ;;  %2321 = vmatpush3.msra.mxu1 %v2767_v11 }
   0x8   :  { %117 = vmatprep.subr.mxu0 %v36_v9 }
   0x9   :  { %118 = vmatpush1.msra.mxu0 %v35_v10 }
   0xa   :  { %12 = vsyncpa [#allocation4], 0  ;;  %2126 = vmatmul.mubr.msk.f32.vlgmr.msra.gmra.mxu0 %vm55_vm1, %v27_v12  ;;  %2322 = vmatprep.subr.mxu1 %v2680_v5  ;;  %vm2681_vm2 = vmmov 0   ;;  %v28_v14 = vld [vmem:[%s3457_s0 + $0x8] sm:$0xff]  ;;  %v2791_v15 = vld [vmem:[%s3461_s4 + $0x18] sm:$0xff]  ;;  %v45_v25 = vlaneseq  ;;  %vm226_vm3 = vcmask 261120  }
   0xb   :  { %2323 = vmatpush3.msra.mxu1 %v2777_v13  ;;  %2324 = vmatprep.mubr.msk.f32.mxu1 %vm2681_vm2, %v2680_v5  ;;  %v2799_v16 = vld [vmem:[%s3461_s4 + $0x10] sm:$0xff]  ;;  %v2813_v18 = vld [vmem:[%s3461_s4 + $0x8] sm:$0xff]  ;;  %v2821_v19 = vld [vmem:[%s3461_s4] sm:$0xff]  ;;  %s2684_s13 = smov 96   ;;  %vm1866_vm4 = vcmask 523264   ;;  %vm1868_vm5 = vcmask 785408  }
   0xc   :  { %2325 = vmatmul.mubr.f32.vlgmr.msra.gmra.mxu1 %v2680_v5  ;;  %157 = vmatprep.mubr.f32.mxu0 %v2680_v5  ;;  %v29_v17 = vld [vmem:[%s3457_s0 + $0x10] sm:$0xff]  ;;  %v30_v20 = vld [vmem:[%s3457_s0 + $0x18] sm:$0xff]  ;;  %v31_v21 = vld [vmem:[%s3457_s0 + $0x20] sm:$0xff]  ;;  %v46_v26 = vshrl.u32 %v45_v25, 7  ;;  %vm2108_vm6 = vcmask 228352  }
   0xd   :  { %2327 = vmatprep.subr.mxu1 %v2680_v5  ;;  %2335 = vmatprep.mubr.msk.f32.mxu1 %vm2681_vm2, %v2680_v5  ;;  %v32_v22 = vld [vmem:[%s3457_s0 + $0x28] sm:$0xff]  ;;  %v33_v23 = vld [vmem:[%s3457_s0 + $0x30] sm:$0xff]  ;;  %v34_v24 = vld [vmem:[%s3457_s0 + $0x38] sm:$0xff]  ;;  %s2682_s0 = smov 64  }
   0xe   :  { %2127 = vmatmul.mubr.msk.f32.gmra.mxu0 %vm55_vm1, %v28_v14  ;;  %2328 = vmatpush3.msra.mxu1 %v2791_v15  ;;  %v47_v27 = vsub.s32 0, %v46_v26  ;;  %v43_v28 = vld [vmem:[%s3459_s2] sm:$0x3]  ;;  %v51_v29 = vsub.s32 1, %v46_v26  ;;  %s2683_s2 = smov 32  }
   0xf   :  { %163 = vmatprep.mubr.f32.mxu0 %v2680_v5  ;;  %2329 = vmatprep.subr.mxu1 %v2680_v5 }
  0x10   :  { %2330 = vmatpush3.msra.mxu1 %v2799_v16  ;;  %2360 = vmatprep.subr.mxu0 %v2680_v5  ;;  %v48_v30 = vrot.slane %v43_v28, %v47_v27  ;;  %v52_v31 = vrot.slane %v43_v28, %v51_v29 }
  0x11   :  { %2331 = vmatprep.subr.mxu1 %v2680_v5  ;;  %2361 = vmatpush3.msra.mxu0 %v2741_v4 }
  0x12   :  { %2128 = vmatmul.mubr.msk.f32.gmra.mxu0 %vm55_vm1, %v29_v17  ;;  %2332 = vmatpush3.msra.mxu1 %v2813_v18 }
  0x13   :  { %169 = vmatprep.mubr.f32.mxu0 %v2680_v5  ;;  %2333 = vmatprep.subr.mxu1 %v2680_v5 }
  0x14   :  { %2334 = vmatpush3.msra.mxu1 %v2821_v19  ;;  %2362 = vmatprep.subr.mxu0 %v2680_v5 }
  0x15   :  { %2336 = vmatmul.mubr.f32.vlgmr.msra.gmra.mxu1 %v2680_v5  ;;  %2338 = vmatprep.subr.mxu1 %v2680_v5 }
  0x16   :  { %2129 = vmatmul.mubr.msk.f32.gmra.mxu0 %vm55_vm1, %v30_v20  ;;  %2339 = vmatpush3.msra.mxu1 %v2741_v4 }
  0x17   :  { %175 = vmatprep.mubr.f32.mxu0 %v2680_v5  ;;  %2340 = vmatprep.subr.mxu1 %v2680_v5 }
  0x18   :  { %2341 = vmatpush3.msra.mxu1 %v2750_v7  ;;  %2346 = vmatprep.mubr.msk.f32.mxu1 %vm2681_vm2, %v2680_v5 }
  0x19   :  { %2342 = vmatprep.subr.mxu1 %v2680_v5  ;;  %2363 = vmatpush3.msra.mxu0 %v2750_v7 }
  0x1a   :  { %2130 = vmatmul.mubr.msk.f32.gmra.mxu0 %vm55_vm1, %v31_v21  ;;  %2343 = vmatpush3.msra.mxu1 %v2767_v11 }
  0x1b   :  { %181 = vmatprep.mubr.f32.mxu0 %v2680_v5  ;;  %2344 = vmatprep.subr.mxu1 %v2680_v5 }
  0x1c   :  { %2345 = vmatpush3.msra.mxu1 %v2777_v13  ;;  %2364 = vmatprep.subr.mxu0 %v2680_v5 }
  0x1d   :  { %2349 = vmatprep.subr.mxu1 %v2680_v5  ;;  %2365 = vmatpush3.msra.mxu0 %v2767_v11 }
  0x1e   :  { %2131 = vmatmul.mubr.msk.f32.gmra.mxu0 %vm55_vm1, %v32_v22  ;;  %2366 = vmatprep.subr.mxu0 %v2680_v5 }
  0x1f   :  { %187 = vmatprep.mubr.f32.mxu0 %v2680_v5  ;;  %2367 = vmatpush3.msra.mxu0 %v2777_v13 }
  0x20   :  { %2382 = vmatprep.subr.mxu0 %v2680_v5 }
  0x22   :  { %2132 = vmatmul.mubr.msk.f32.gmra.mxu0 %vm55_vm1, %v33_v23 }
  0x23   :  { %193 = vmatprep.mubr.f32.mxu0 %v2680_v5 }
  0x26   :  { %2133 = vmatmul.mubr.msk.f32.gmra.mxu0 %vm55_vm1, %v34_v24 }
  0x27   :  { %2368 = vmatprep.mubr.msk.f32.mxu0 %vm2681_vm2, %v2680_v5 }
  0xca   :  { %v153_v32 = vpop.f32.mrf.mxu0 }
  0xcb   :  { %v154_v33 = vadd.f32 %v153_v32, %v48_v30 }
  0xcc   :  { %v155_v34 = vpop.f32.mrf.mxu0  ;;  %v296_v35 = vpop.f32.mrf.mxu1 }
  0xcd   :  { %v2877_v36 = vadd.f32 %v155_v34, %v52_v31  ;;  %v300_v37 = vadd.f32 %v296_v35, %v154_v33 }
  0xce   :  { %v159_v38 = vpop.f32.mrf.mxu0  ;;  %v2326_v39 = vpop.f32.mrf.mxu1 }
  0xcf   :  { %2518 = vtanh.f32 %v300_v37  ;;  %v2879_v40 = vadd.f32 %v159_v38, %v48_v30  ;;  %v2134_v12 = vmul.f32 -1.442695, %v300_v37 }
  0xd0   :  { %v161_v41 = vpop.f32.mrf.mxu0 }
  0xd1   :  { %v2881_v42 = vadd.f32 %v161_v41, %v52_v31 }
  0xd2   :  { %v165_v43 = vpop.f32.mrf.mxu0 }
  0xd3   :  { %v2883_v44 = vadd.f32 %v165_v43, %v48_v30 }
  0xd4   :  { %v167_v45 = vpop.f32.mrf.mxu0 }
  0xd5   :  { %v2885_v46 = vadd.f32 %v167_v45, %v52_v31  ;;  %v391_v47 = vpop.f32.mrf.mxu1 }
  0xd6   :  { %v171_v48 = vpop.f32.mrf.mxu0 }
  0xd7   :  { %v2887_v49 = vadd.f32 %v171_v48, %v48_v30  ;;  %v2337_v50 = vpop.f32.mrf.mxu1 }
  0xd8   :  { %v173_v51 = vpop.f32.mrf.mxu0 }
  0xd9   :  { %v2889_v52 = vadd.f32 %v173_v51, %v52_v31 }
  0xda   :  { %v177_v53 = vpop.f32.mrf.mxu0 }
  0xdb   :  { %v2891_v54 = vadd.f32 %v177_v53, %v48_v30 }
  0xdc   :  { %v2519_v55 = vpop.eup %2518  ;;  %v179_v56 = vpop.f32.mrf.mxu0 }
  0xdd   :  { %v2893_v57 = vadd.f32 %v179_v56, %v52_v31  ;;  %310 = vrot.lane.b32.xlu0 %v2519_v55, %s2682_s0 }
  0xde   :  { %v183_v58 = vpop.f32.mrf.mxu0 }
  0xdf   :  { %v2896_v59 = vadd.f32 %v183_v58, %v48_v30 }
  0xe0   :  { %v185_v60 = vpop.f32.mrf.mxu0 }
  0xe1   :  { %v2898_v61 = vadd.f32 %v185_v60, %v52_v31 }
  0xe2   :  { %v189_v62 = vpop.f32.mrf.mxu0 }
  0xe3   :  { %v2900_v63 = vadd.f32 %v189_v62, %v48_v30 }
  0xe4   :  { %v191_v0 = vpop.f32.mrf.mxu0 }
  0xe5   :  { %v2902_v1 = vadd.f32 %v191_v0, %v52_v31 }
  0xe6   :  { %v195_v2 = vpop.f32.mrf.mxu0 }
  0xe7   :  { %v2904_v3 = vadd.f32 %v195_v2, %v48_v30 }
  0xe8   :  { %v197_v6 = vpop.f32.mrf.mxu0 }
  0xe9   :  { %v198_v8 = vadd.f32 %v197_v6, %v52_v31 }
  0xeb   :  { %v395_v9 = vadd.f32 %v391_v47, %v198_v8 }
  0xed   :  { %2520 = vtanh.f32 %v395_v9  ;;  %v2135_v20 = vmul.f32 -1.442695, %v395_v9 }
  0xee   :  { %2522 = vpow2.f32 %v2134_v12 }
  0xfa   :  { %v2521_v10 = vpop.eup %2520 }
  0xfb   :  { %405 = vrot.lane.b32.xlu0 %v2521_v10, %s2682_s0  ;;  %v2523_v14 = vpop.eup %2522 }
  0xfc   :  { %v304_v17 = vadd.f32 1.0, %v2523_v14 }
  0xfe   :  { %2524 = vrcp.f32 %v304_v17 }
  0xff   :  { %2526 = vpow2.f32 %v2135_v20 }
 0x10b   :  { %v2525_v21 = vpop.eup %2524 }
 0x10c   :  { %v2527_v24 = vpop.eup %2526  ;;  %v308_v29 = vmul.f32 0.0, %v2525_v21 }
 0x10d   :  { %v399_v25 = vadd.f32 1.0, %v2527_v24 }
 0x10f   :  { %2528 = vrcp.f32 %v399_v25 }
 0x11c   :  { %v2529_v26 = vpop.eup %2528 }
 0x11d   :  { %v403_v33 = vmul.f32 0.0, %v2529_v26 }
 0x14f   :  { %v311_v22 = vpop.permute.xlu0 %310 }
 0x150   :  { %v313_v23 = vmul.f32 %v2525_v21, %v311_v22 }
 0x152   :  { %315 = vrot.lane.b32.xlu1 %v313_v23, %s2683_s2 }
 0x16d   :  { %v406_v27 = vpop.permute.xlu0 %405 }
 0x16e   :  { %v408_v28 = vmul.f32 %v2529_v26, %v406_v27 }
 0x170   :  { %410 = vrot.lane.b32.xlu1 %v408_v28, %s2683_s2 }
 0x1c4   :  { %v316_v30 = vpop.permute.xlu1 %315 }
 0x1c5   :  { %v2909_v31 = vadd.f32 %v316_v30, %v308_v29 }
 0x1c7   :  { %2530 = vtanh.f32 %v2909_v31 }
 0x1d4   :  { %v2531_v32 = vpop.eup %2530 }
 0x1d5   :  { %321 = vrot.lane.b32.xlu0 %v2531_v32, %s2682_s0 }
 0x1e2   :  { %v411_v34 = vpop.permute.xlu1 %410 }
 0x1e3   :  { %v2913_v35 = vadd.f32 %v411_v34, %v403_v33 }
 0x1e5   :  { %2532 = vtanh.f32 %v2913_v35 }
 0x1f2   :  { %v2533_v37 = vpop.eup %2532 }
 0x1f3   :  { %416 = vrot.lane.b32.xlu1 %v2533_v37, %s2682_s0 }
 0x247   :  { %v322_v38 = vpop.permute.xlu0 %321 }
 0x248   :  { %v324_v39 = vmul.f32 %v2525_v21, %v322_v38 }
 0x24a   :  { %423 = vrot.lane.b32.xlu0 %v324_v39, %s2683_s2 }
 0x265   :  { %v417_v41 = vpop.permute.xlu1 %416 }
 0x266   :  { %v2918_v43 = vmul.f32 %v2529_v26, %v417_v41 }
 0x268   :  { %523 = vrot.lane.b32.xlu1 %v2918_v43, %s2683_s2 }
 0x2bc   :  { %v2922_v45 = vpop.permute.xlu0 %423 }
 0x2bd   :  { %2347 = vmatmul.mubr.msk.f32.vlgmr.msra.gmra.mxu1 %vm226_vm3, %v2922_v45 }
 0x2be   :  { %2350 = vmatpush3.msra.mxu1 %v2791_v15  ;;  %2357 = vmatprep.mubr.msk.f32.mxu1 %vm2681_vm2, %v2680_v5 }
 0x2bf   :  { %2351 = vmatprep.subr.mxu1 %v2680_v5 }
 0x2c0   :  { %2352 = vmatpush3.msra.mxu1 %v2799_v16 }
 0x2c1   :  { %2353 = vmatprep.subr.mxu1 %v2680_v5 }
 0x2c2   :  { %2354 = vmatpush3.msra.mxu1 %v2813_v18 }
 0x2c3   :  { %2355 = vmatprep.subr.mxu1 %v2680_v5 }
 0x2c4   :  { %2356 = vmatpush3.msra.mxu1 %v2821_v19 }
 0x2c5   :  { %2371 = vmatprep.subr.mxu1 %v2680_v5 }
 0x2da   :  { %v524_v47 = vpop.permute.xlu1 %523 }
 0x2db   :  { %2358 = vmatmul.mubr.msk.f32.vlgmr.msra.gmra.mxu1 %vm226_vm3, %v524_v47 }
 0x2dc   :  { %2372 = vmatpush3.msra.mxu1 %v2791_v15  ;;  %2379 = vmatprep.mubr.msk.f32.mxu1 %vm2681_vm2, %v2680_v5 }
 0x2dd   :  { %2373 = vmatprep.subr.mxu1 %v2680_v5 }
 0x2de   :  { %2374 = vmatpush3.msra.mxu1 %v2799_v16 }
 0x2df   :  { %2375 = vmatprep.subr.mxu1 %v2680_v5 }
 0x2e0   :  { %2376 = vmatpush3.msra.mxu1 %v2813_v18 }
 0x2e1   :  { %2377 = vmatprep.subr.mxu1 %v2680_v5 }
 0x2e2   :  { %2378 = vmatpush3.msra.mxu1 %v2821_v19 }
 0x2e3   :  { %2393 = vmatprep.subr.mxu1 %v2680_v5 }
 0x37d   :  { %v493_v48 = vpop.f32.mrf.mxu1 }
 0x37e   :  { %v497_v50 = vadd.f32 %v493_v48, %v2879_v40 }
 0x37f   :  { %v2348_v51 = vpop.f32.mrf.mxu1 }
 0x380   :  { %2534 = vtanh.f32 %v497_v50  ;;  %v2137_v62 = vmul.f32 -1.442695, %v497_v50 }
 0x38d   :  { %v2535_v53 = vpop.eup %2534 }
 0x38e   :  { %507 = vrot.lane.b32.xlu1 %v2535_v53, %s2682_s0 }
 0x39b   :  { %v593_v55 = vpop.f32.mrf.mxu1 }
 0x39c   :  { %v597_v56 = vadd.f32 %v593_v55, %v2902_v1 }
 0x39d   :  { %v2359_v58 = vpop.f32.mrf.mxu1 }
 0x39e   :  { %2536 = vtanh.f32 %v597_v56  ;;  %v2139_v6 = vmul.f32 -1.442695, %v597_v56 }
 0x39f   :  { %2538 = vpow2.f32 %v2137_v62 }
 0x3ab   :  { %v2537_v60 = vpop.eup %2536 }
 0x3ac   :  { %607 = vrot.lane.b32.xlu0 %v2537_v60, %s2682_s0  ;;  %v2539_v0 = vpop.eup %2538 }
 0x3ad   :  { %v501_v2 = vadd.f32 1.0, %v2539_v0 }
 0x3af   :  { %2540 = vrcp.f32 %v501_v2 }
 0x3b0   :  { %2542 = vpow2.f32 %v2139_v6 }
 0x3bc   :  { %v2541_v40 = vpop.eup %2540 }
 0x3bd   :  { %v2543_v10 = vpop.eup %2542  ;;  %v505_v20 = vmul.f32 %v2541_v40, %v2909_v31 }
 0x3be   :  { %v601_v12 = vadd.f32 1.0, %v2543_v10 }
 0x3c0   :  { %2544 = vrcp.f32 %v601_v12 }
 0x3cd   :  { %v2545_v1 = vpop.eup %2544 }
 0x3ce   :  { %v605_v24 = vmul.f32 %v2545_v1, %v2913_v35 }
 0x400   :  { %v508_v8 = vpop.permute.xlu1 %507 }
 0x401   :  { %v510_v9 = vmul.f32 %v2541_v40, %v508_v8 }
 0x403   :  { %512 = vrot.lane.b32.xlu1 %v510_v9, %s2683_s2 }
 0x41e   :  { %v608_v14 = vpop.permute.xlu0 %607 }
 0x41f   :  { %v610_v17 = vmul.f32 %v2545_v1, %v608_v14 }
 0x421   :  { %612 = vrot.lane.b32.xlu0 %v610_v17, %s2683_s2 }
 0x475   :  { %v513_v21 = vpop.permute.xlu1 %512 }
 0x476   :  { %v2954_v22 = vadd.f32 %v513_v21, %v505_v20 }
 0x478   :  { %2546 = vtanh.f32 %v2954_v22 }
 0x485   :  { %v2547_v23 = vpop.eup %2546 }
 0x486   :  { %518 = vrot.lane.b32.xlu1 %v2547_v23, %s2682_s0 }
 0x493   :  { %v613_v25 = vpop.permute.xlu0 %612 }
 0x494   :  { %v2959_v26 = vadd.f32 %v613_v25, %v605_v24 }
 0x496   :  { %2548 = vtanh.f32 %v2959_v26 }
 0x4a3   :  { %v2549_v27 = vpop.eup %2548 }
 0x4a4   :  { %618 = vrot.lane.b32.xlu0 %v2549_v27, %s2682_s0 }
 0x4f8   :  { %v519_v28 = vpop.permute.xlu1 %518 }
 0x4f9   :  { %v2963_v29 = vmul.f32 %v2541_v40, %v519_v28 }
 0x4fb   :  { %625 = vrot.lane.b32.xlu1 %v2963_v29, %s2683_s2 }
 0x516   :  { %v619_v30 = vpop.permute.xlu0 %618 }
 0x517   :  { %v2967_v31 = vmul.f32 %v2545_v1, %v619_v30 }
 0x519   :  { %725 = vrot.lane.b32.xlu0 %v2967_v31, %s2683_s2 }
 0x56d   :  { %v626_v32 = vpop.permute.xlu1 %625 }
 0x56e   :  { %2369 = vmatmul.mubr.msk.f32.vlgmr.msra.gmra.mxu0 %vm226_vm3, %v626_v32 }
 0x56f   :  { %2383 = vmatpush3.msra.mxu0 %v2741_v4  ;;  %2390 = vmatprep.mubr.msk.f32.mxu0 %vm2681_vm2, %v2680_v5 }
 0x570   :  { %2384 = vmatprep.subr.mxu0 %v2680_v5 }
 0x571   :  { %2385 = vmatpush3.msra.mxu0 %v2750_v7 }
 0x572   :  { %2386 = vmatprep.subr.mxu0 %v2680_v5 }
 0x573   :  { %2387 = vmatpush3.msra.mxu0 %v2767_v11 }
 0x574   :  { %2388 = vmatprep.subr.mxu0 %v2680_v5 }
 0x575   :  { %2389 = vmatpush3.msra.mxu0 %v2777_v13 }
 0x576   :  { %2404 = vmatprep.subr.mxu0 %v2680_v5 }
 0x58b   :  { %v726_v33 = vpop.permute.xlu0 %725 }
 0x58c   :  { %2380 = vmatmul.mubr.msk.f32.vlgmr.msra.gmra.mxu1 %vm226_vm3, %v726_v33 }
 0x58d   :  { %2394 = vmatpush3.msra.mxu1 %v2791_v15  ;;  %2401 = vmatprep.mubr.msk.f32.mxu1 %vm2681_vm2, %v2680_v5 }
 0x58e   :  { %2395 = vmatprep.subr.mxu1 %v2680_v5 }
 0x58f   :  { %2396 = vmatpush3.msra.mxu1 %v2799_v16 }
 0x590   :  { %2397 = vmatprep.subr.mxu1 %v2680_v5 }
 0x591   :  { %2398 = vmatpush3.msra.mxu1 %v2813_v18 }
 0x592   :  { %2399 = vmatprep.subr.mxu1 %v2680_v5 }
 0x593   :  { %2400 = vmatpush3.msra.mxu1 %v2821_v19 }
 0x594   :  { %2415 = vmatprep.subr.mxu1 %v2680_v5 }
 0x62e   :  { %v695_v34 = vpop.f32.mrf.mxu0 }
 0x62f   :  { %v699_v35 = vadd.f32 %v695_v34, %v2883_v44 }
 0x630   :  { %v2370_v37 = vpop.f32.mrf.mxu0 }
 0x631   :  { %2550 = vtanh.f32 %v699_v35  ;;  %v2141_v50 = vmul.f32 -1.442695, %v699_v35 }
 0x63e   :  { %v2551_v38 = vpop.eup %2550 }
 0x63f   :  { %709 = vrot.lane.b32.xlu1 %v2551_v38, %s2682_s0 }
 0x64c   :  { %v795_v39 = vpop.f32.mrf.mxu1 }
 0x64d   :  { %v799_v41 = vadd.f32 %v795_v39, %v2898_v61 }
 0x64e   :  { %v2381_v47 = vpop.f32.mrf.mxu1 }
 0x64f   :  { %2552 = vtanh.f32 %v799_v41  ;;  %v2143_v55 = vmul.f32 -1.442695, %v799_v41 }
 0x650   :  { %2554 = vpow2.f32 %v2141_v50 }
 0x65c   :  { %v2553_v48 = vpop.eup %2552 }
 0x65d   :  { %809 = vrot.lane.b32.xlu0 %v2553_v48, %s2682_s0  ;;  %v2555_v51 = vpop.eup %2554 }
 0x65e   :  { %v703_v53 = vadd.f32 1.0, %v2555_v51 }
 0x660   :  { %2556 = vrcp.f32 %v703_v53 }
 0x661   :  { %2558 = vpow2.f32 %v2143_v55 }
 0x66d   :  { %v2557_v44 = vpop.eup %2556 }
 0x66e   :  { %v2559_v60 = vpop.eup %2558  ;;  %v707_v6 = vmul.f32 %v2557_v44, %v2954_v22 }
 0x66f   :  { %v803_v62 = vadd.f32 1.0, %v2559_v60 }
 0x671   :  { %2560 = vrcp.f32 %v803_v62 }
 0x67e   :  { %v2561_v61 = vpop.eup %2560 }
 0x67f   :  { %v807_v10 = vmul.f32 %v2561_v61, %v2959_v26 }
 0x6b1   :  { %v710_v56 = vpop.permute.xlu1 %709 }
 0x6b2   :  { %v712_v58 = vmul.f32 %v2557_v44, %v710_v56 }
 0x6b4   :  { %714 = vrot.lane.b32.xlu1 %v712_v58, %s2683_s2 }
 0x6cf   :  { %v810_v0 = vpop.permute.xlu0 %809 }
 0x6d0   :  { %v812_v2 = vmul.f32 %v2561_v61, %v810_v0 }
 0x6d2   :  { %814 = vrot.lane.b32.xlu0 %v812_v2, %s2683_s2 }
 0x726   :  { %v715_v40 = vpop.permute.xlu1 %714 }
 0x727   :  { %v3000_v8 = vadd.f32 %v715_v40, %v707_v6 }
 0x729   :  { %2562 = vtanh.f32 %v3000_v8 }
 0x736   :  { %v2563_v9 = vpop.eup %2562 }
 0x737   :  { %720 = vrot.lane.b32.xlu1 %v2563_v9, %s2682_s0 }
 0x744   :  { %v815_v12 = vpop.permute.xlu0 %814 }
 0x745   :  { %v3005_v1 = vadd.f32 %v815_v12, %v807_v10 }
 0x747   :  { %2564 = vtanh.f32 %v3005_v1 }
 0x754   :  { %v2565_v14 = vpop.eup %2564 }
 0x755   :  { %820 = vrot.lane.b32.xlu0 %v2565_v14, %s2682_s0 }
 0x7a9   :  { %v721_v17 = vpop.permute.xlu1 %720 }
 0x7aa   :  { %v3009_v20 = vmul.f32 %v2557_v44, %v721_v17 }
 0x7ac   :  { %827 = vrot.lane.b32.xlu1 %v3009_v20, %s2683_s2 }
 0x7c7   :  { %v821_v21 = vpop.permute.xlu0 %820 }
 0x7c8   :  { %v3013_v22 = vmul.f32 %v2561_v61, %v821_v21 }
 0x7ca   :  { %927 = vrot.lane.b32.xlu0 %v3013_v22, %s2683_s2 }
 0x81e   :  { %v828_v23 = vpop.permute.xlu1 %827 }
 0x81f   :  { %2391 = vmatmul.mubr.msk.f32.vlgmr.msra.gmra.mxu0 %vm226_vm3, %v828_v23 }
 0x820   :  { %2405 = vmatpush3.msra.mxu0 %v2741_v4  ;;  %2412 = vmatprep.mubr.msk.f32.mxu0 %vm2681_vm2, %v2680_v5 }
 0x821   :  { %2406 = vmatprep.subr.mxu0 %v2680_v5 }
 0x822   :  { %2407 = vmatpush3.msra.mxu0 %v2750_v7 }
 0x823   :  { %2408 = vmatprep.subr.mxu0 %v2680_v5 }
 0x824   :  { %2409 = vmatpush3.msra.mxu0 %v2767_v11 }
 0x825   :  { %2410 = vmatprep.subr.mxu0 %v2680_v5 }
 0x826   :  { %2411 = vmatpush3.msra.mxu0 %v2777_v13 }
 0x827   :  { %2426 = vmatprep.subr.mxu0 %v2680_v5 }
 0x83c   :  { %v928_v24 = vpop.permute.xlu0 %927 }
 0x83d   :  { %2402 = vmatmul.mubr.msk.f32.vlgmr.msra.gmra.mxu1 %vm226_vm3, %v928_v24 }
 0x83e   :  { %2416 = vmatpush3.msra.mxu1 %v2791_v15  ;;  %2423 = vmatprep.mubr.msk.f32.mxu1 %vm2681_vm2, %v2680_v5 }
 0x83f   :  { %2417 = vmatprep.subr.mxu1 %v2680_v5 }
 0x840   :  { %2418 = vmatpush3.msra.mxu1 %v2799_v16 }
 0x841   :  { %2419 = vmatprep.subr.mxu1 %v2680_v5 }
 0x842   :  { %2420 = vmatpush3.msra.mxu1 %v2813_v18 }
 0x843   :  { %2421 = vmatprep.subr.mxu1 %v2680_v5 }
 0x844   :  { %2422 = vmatpush3.msra.mxu1 %v2821_v19 }
 0x845   :  { %2437 = vmatprep.subr.mxu1 %v2680_v5 }
 0x8df   :  { %v897_v25 = vpop.f32.mrf.mxu0 }
 0x8e0   :  { %v901_v26 = vadd.f32 %v897_v25, %v2887_v49 }
 0x8e1   :  { %v2392_v27 = vpop.f32.mrf.mxu0 }
 0x8e2   :  { %2566 = vtanh.f32 %v901_v26  ;;  %v2145_v35 = vmul.f32 -1.442695, %v901_v26 }
 0x8ef   :  { %v2567_v28 = vpop.eup %2566 }
 0x8f0   :  { %911 = vrot.lane.b32.xlu1 %v2567_v28, %s2682_s0 }
 0x8fd   :  { %v997_v30 = vpop.f32.mrf.mxu1 }
 0x8fe   :  { %v1001_v32 = vadd.f32 %v997_v30, %v2893_v57 }
 0x8ff   :  { %v2403_v33 = vpop.f32.mrf.mxu1 }
 0x900   :  { %2568 = vtanh.f32 %v1001_v32  ;;  %v2147_v39 = vmul.f32 -1.442695, %v1001_v32 }
 0x901   :  { %2570 = vpow2.f32 %v2145_v35 }
 0x90d   :  { %v2569_v34 = vpop.eup %2568 }
 0x90e   :  { %1011 = vrot.lane.b32.xlu0 %v2569_v34, %s2682_s0  ;;  %v2571_v37 = vpop.eup %2570 }
 0x90f   :  { %v905_v38 = vadd.f32 1.0, %v2571_v37 }
 0x911   :  { %2572 = vrcp.f32 %v905_v38 }
 0x912   :  { %2574 = vpow2.f32 %v2147_v39 }
 0x91e   :  { %v2573_v49 = vpop.eup %2572 }
 0x91f   :  { %v2575_v48 = vpop.eup %2574  ;;  %v909_v55 = vmul.f32 %v2573_v49, %v3000_v8 }
 0x920   :  { %v1005_v50 = vadd.f32 1.0, %v2575_v48 }
 0x922   :  { %2576 = vrcp.f32 %v1005_v50 }
 0x92f   :  { %v2577_v57 = vpop.eup %2576 }
 0x930   :  { %v1009_v60 = vmul.f32 %v2577_v57, %v3005_v1 }
 0x962   :  { %v912_v41 = vpop.permute.xlu1 %911 }
 0x963   :  { %v914_v47 = vmul.f32 %v2573_v49, %v912_v41 }
 0x965   :  { %916 = vrot.lane.b32.xlu1 %v914_v47, %s2683_s2 }
 0x980   :  { %v1012_v51 = vpop.permute.xlu0 %1011 }
 0x981   :  { %v1014_v53 = vmul.f32 %v2577_v57, %v1012_v51 }
 0x983   :  { %1016 = vrot.lane.b32.xlu0 %v1014_v53, %s2683_s2 }
 0x9d7   :  { %v917_v44 = vpop.permute.xlu1 %916 }
 0x9d8   :  { %v3046_v56 = vadd.f32 %v917_v44, %v909_v55 }
 0x9da   :  { %2578 = vtanh.f32 %v3046_v56 }
 0x9e7   :  { %v2579_v58 = vpop.eup %2578 }
 0x9e8   :  { %922 = vrot.lane.b32.xlu1 %v2579_v58, %s2682_s0 }
 0x9f5   :  { %v1017_v62 = vpop.permute.xlu0 %1016 }
 0x9f6   :  { %v3051_v61 = vadd.f32 %v1017_v62, %v1009_v60 }
 0x9f8   :  { %2580 = vtanh.f32 %v3051_v61 }
 0xa05   :  { %v2581_v0 = vpop.eup %2580 }
 0xa06   :  { %1022 = vrot.lane.b32.xlu0 %v2581_v0, %s2682_s0 }
 0xa5a   :  { %v923_v2 = vpop.permute.xlu1 %922 }
 0xa5b   :  { %v3055_v6 = vmul.f32 %v2573_v49, %v923_v2 }
 0xa5d   :  { %1029 = vrot.lane.b32.xlu1 %v3055_v6, %s2683_s2 }
 0xa78   :  { %v1023_v40 = vpop.permute.xlu0 %1022 }
 0xa79   :  { %v1025_v8 = vmul.f32 %v2577_v57, %v1023_v40 }
 0xa7b   :  { %1129 = vrot.lane.b32.xlu0 %v1025_v8, %s2683_s2 }
 0xacf   :  { %v1030_v9 = vpop.permute.xlu1 %1029 }
 0xad0   :  { %2413 = vmatmul.mubr.msk.f32.vlgmr.msra.gmra.mxu0 %vm226_vm3, %v1030_v9 }
 0xad1   :  { %2427 = vmatpush3.msra.mxu0 %v2741_v4  ;;  %2434 = vmatprep.mubr.msk.f32.mxu0 %vm2681_vm2, %v2680_v5 }
 0xad2   :  { %2428 = vmatprep.subr.mxu0 %v2680_v5 }
 0xad3   :  { %2429 = vmatpush3.msra.mxu0 %v2750_v7 }
 0xad4   :  { %2430 = vmatprep.subr.mxu0 %v2680_v5 }
 0xad5   :  { %2431 = vmatpush3.msra.mxu0 %v2767_v11 }
 0xad6   :  { %2432 = vmatprep.subr.mxu0 %v2680_v5 }
 0xad7   :  { %2433 = vmatpush3.msra.mxu0 %v2777_v13 }
 0xad8   :  { %2448 = vmatprep.subr.mxu0 %v2680_v5 }
 0xaed   :  { %v3071_v10 = vpop.permute.xlu0 %1129 }
 0xaee   :  { %2424 = vmatmul.mubr.msk.f32.vlgmr.msra.gmra.mxu1 %vm226_vm3, %v3071_v10 }
 0xaef   :  { %2438 = vmatpush3.msra.mxu1 %v2791_v15  ;;  %2445 = vmatprep.mubr.msk.f32.mxu1 %vm2681_vm2, %v2680_v5 }
 0xaf0   :  { %2439 = vmatprep.subr.mxu1 %v2680_v5 }
 0xaf1   :  { %2440 = vmatpush3.msra.mxu1 %v2799_v16 }
 0xaf2   :  { %2441 = vmatprep.subr.mxu1 %v2680_v5 }
 0xaf3   :  { %2442 = vmatpush3.msra.mxu1 %v2813_v18 }
 0xaf4   :  { %2443 = vmatprep.subr.mxu1 %v2680_v5 }
 0xaf5   :  { %2444 = vmatpush3.msra.mxu1 %v2821_v19 }
 0xaf6   :  { %2459 = vmatprep.subr.mxu1 %v2680_v5 }
 0xb90   :  { %v1099_v12 = vpop.f32.mrf.mxu0 }
 0xb91   :  { %v1103_v1 = vadd.f32 %v1099_v12, %v2891_v54 }
 0xb92   :  { %v2414_v14 = vpop.f32.mrf.mxu0 }
 0xb93   :  { %2582 = vtanh.f32 %v1103_v1  ;;  %v2149_v26 = vmul.f32 -1.442695, %v1103_v1 }
 0xba0   :  { %v2583_v17 = vpop.eup %2582 }
 0xba1   :  { %1113 = vrot.lane.b32.xlu1 %v2583_v17, %s2682_s0 }
 0xbae   :  { %v1199_v21 = vpop.f32.mrf.mxu1 }
 0xbaf   :  { %v1203_v23 = vadd.f32 %v1199_v21, %v2889_v52 }
 0xbb0   :  { %v2425_v24 = vpop.f32.mrf.mxu1 }
 0xbb1   :  { %2584 = vtanh.f32 %v1203_v23  ;;  %v2151_v30 = vmul.f32 -1.442695, %v1203_v23 }
 0xbb2   :  { %2586 = vpow2.f32 %v2149_v26 }
 0xbbe   :  { %v2585_v25 = vpop.eup %2584 }
 0xbbf   :  { %1213 = vrot.lane.b32.xlu0 %v2585_v25, %s2682_s0  ;;  %v2587_v27 = vpop.eup %2586 }
 0xbc0   :  { %v1107_v28 = vadd.f32 1.0, %v2587_v27 }
 0xbc2   :  { %2588 = vrcp.f32 %v1107_v28 }
 0xbc3   :  { %2590 = vpow2.f32 %v2151_v30 }
 0xbcf   :  { %v2589_v54 = vpop.eup %2588 }
 0xbd0   :  { %v2591_v34 = vpop.eup %2590  ;;  %v1111_v39 = vmul.f32 %v2589_v54, %v3046_v56 }
 0xbd1   :  { %v1207_v35 = vadd.f32 1.0, %v2591_v34 }
 0xbd3   :  { %2592 = vrcp.f32 %v1207_v35 }
 0xbe0   :  { %v2593_v52 = vpop.eup %2592 }
 0xbe1   :  { %v1211_v48 = vmul.f32 %v2593_v52, %v3051_v61 }
 0xc13   :  { %v1114_v32 = vpop.permute.xlu1 %1113 }
 0xc14   :  { %v1116_v33 = vmul.f32 %v2589_v54, %v1114_v32 }
 0xc16   :  { %1118 = vrot.lane.b32.xlu1 %v1116_v33, %s2683_s2 }
 0xc31   :  { %v1214_v37 = vpop.permute.xlu0 %1213 }
 0xc32   :  { %v1216_v38 = vmul.f32 %v2593_v52, %v1214_v37 }
 0xc34   :  { %1218 = vrot.lane.b32.xlu0 %v1216_v38, %s2683_s2 }
 0xc88   :  { %v1119_v49 = vpop.permute.xlu1 %1118 }
 0xc89   :  { %v3092_v41 = vadd.f32 %v1119_v49, %v1111_v39  ;;  %v2654_v39 = vld [vmem:[%s3460_s3 + $0x18] sm:$0xff]  ;;  %v2655_v49 = vld [vmem:[%s3460_s3 + $0x10] sm:$0xff] }
 0xc8b   :  { %2594 = vtanh.f32 %v3092_v41 }
 0xc98   :  { %v2595_v47 = vpop.eup %2594 }
 0xc99   :  { %1124 = vrot.lane.b32.xlu1 %v2595_v47, %s2682_s0  ;;  %v2657_v47 = vld [vmem:[%s3460_s3] sm:$0xff] }
 0xca6   :  { %v1219_v50 = vpop.permute.xlu0 %1218 }
 0xca7   :  { %v3097_v57 = vadd.f32 %v1219_v50, %v1211_v48 }
 0xca9   :  { %2596 = vtanh.f32 %v3097_v57 }
 0xcb6   :  { %v2597_v51 = vpop.eup %2596 }
 0xcb7   :  { %1224 = vrot.lane.b32.xlu0 %v2597_v51, %s2682_s0 }
 0xd0b   :  { %v1125_v53 = vpop.permute.xlu1 %1124 }
 0xd0c   :  { %v1127_v55 = vmul.f32 %v2589_v54, %v1125_v53 }
 0xd0e   :  { %1231 = vrot.lane.b32.xlu1 %v1127_v55, %s2683_s2 }
 0xd29   :  { %v1225_v44 = vpop.permute.xlu0 %1224 }
 0xd2a   :  { %v3102_v56 = vmul.f32 %v2593_v52, %v1225_v44 }
 0xd2c   :  { %1331 = vrot.lane.b32.xlu0 %v3102_v56, %s2683_s2 }
 0xd80   :  { %v3106_v58 = vpop.permute.xlu1 %1231 }
 0xd81   :  { %2435 = vmatmul.mubr.msk.f32.vlgmr.msra.gmra.mxu0 %vm226_vm3, %v3106_v58 }
 0xd82   :  { %2449 = vmatpush3.msra.mxu0 %v2741_v4  ;;  %2456 = vmatprep.mubr.msk.f32.mxu0 %vm2681_vm2, %v2680_v5 }
 0xd83   :  { %2450 = vmatprep.subr.mxu0 %v2680_v5 }
 0xd84   :  { %2451 = vmatpush3.msra.mxu0 %v2750_v7 }
 0xd85   :  { %2452 = vmatprep.subr.mxu0 %v2680_v5 }
 0xd86   :  { %2453 = vmatpush3.msra.mxu0 %v2767_v11 }
 0xd87   :  { %2454 = vmatprep.subr.mxu0 %v2680_v5 }
 0xd88   :  { %2455 = vmatpush3.msra.mxu0 %v2777_v13 }
 0xd89   :  { %2470 = vmatprep.subr.mxu0 %v2680_v5 }
 0xd9e   :  { %v1332_v60 = vpop.permute.xlu0 %1331 }
 0xd9f   :  { %2446 = vmatmul.mubr.msk.f32.vlgmr.msra.gmra.mxu1 %vm226_vm3, %v1332_v60 }
 0xda0   :  { %2460 = vmatpush3.msra.mxu1 %v2791_v15  ;;  %2467 = vmatprep.mubr.msk.f32.mxu1 %vm2681_vm2, %v2680_v5 }
 0xda1   :  { %2461 = vmatprep.subr.mxu1 %v2680_v5 }
 0xda2   :  { %2462 = vmatpush3.msra.mxu1 %v2799_v16 }
 0xda3   :  { %2463 = vmatprep.subr.mxu1 %v2680_v5 }
 0xda4   :  { %2464 = vmatpush3.msra.mxu1 %v2813_v18 }
 0xda5   :  { %2465 = vmatprep.subr.mxu1 %v2680_v5 }
 0xda6   :  { %2466 = vmatpush3.msra.mxu1 %v2821_v19 }
 0xda7   :  { %2481 = vmatprep.subr.mxu1 %v2680_v5 }
 0xe41   :  { %v1301_v4 = vpop.f32.mrf.mxu0 }
 0xe42   :  { %v1305_v7 = vadd.f32 %v1301_v4, %v2896_v59 }
 0xe43   :  { %v2436_v11 = vpop.f32.mrf.mxu0 }
 0xe44   :  { %2598 = vtanh.f32 %v1305_v7  ;;  %v2153_v40 = vmul.f32 -1.442695, %v1305_v7 }
 0xe51   :  { %v2599_v13 = vpop.eup %2598 }
 0xe52   :  { %1315 = vrot.lane.b32.xlu1 %v2599_v13, %s2682_s0 }
 0xe5f   :  { %v1401_v62 = vpop.f32.mrf.mxu1 }
 0xe60   :  { %v1405_v61 = vadd.f32 %v1401_v62, %v2885_v46 }
 0xe61   :  { %v2447_v0 = vpop.f32.mrf.mxu1 }
 0xe62   :  { %2600 = vtanh.f32 %v1405_v61  ;;  %v2155_v12 = vmul.f32 -1.442695, %v1405_v61 }
 0xe63   :  { %2602 = vpow2.f32 %v2153_v40 }
 0xe6f   :  { %v2601_v2 = vpop.eup %2600 }
 0xe70   :  { %1415 = vrot.lane.b32.xlu0 %v2601_v2, %s2682_s0  ;;  %v2603_v8 = vpop.eup %2602 }
 0xe71   :  { %v1309_v9 = vadd.f32 1.0, %v2603_v8 }
 0xe73   :  { %2604 = vrcp.f32 %v1309_v9 }
 0xe74   :  { %2606 = vpow2.f32 %v2155_v12 }
 0xe80   :  { %v2605_v59 = vpop.eup %2604 }
 0xe81   :  { %v2607_v17 = vpop.eup %2606  ;;  %v1313_v25 = vmul.f32 %v2605_v59, %v3092_v41  ;;  %v2656_v41 = vld [vmem:[%s3460_s3 + $0x8] sm:$0xff] }
 0xe82   :  { %v1409_v21 = vadd.f32 1.0, %v2607_v17 }
 0xe84   :  { %2608 = vrcp.f32 %v1409_v21 }
 0xe91   :  { %v2609_v46 = vpop.eup %2608 }
 0xe92   :  { %v1413_v30 = vmul.f32 %v2609_v46, %v3097_v57 }
 0xec4   :  { %v1316_v1 = vpop.permute.xlu1 %1315 }
 0xec5   :  { %v1318_v14 = vmul.f32 %v2605_v59, %v1316_v1 }
 0xec7   :  { %1320 = vrot.lane.b32.xlu1 %v1318_v14, %s2683_s2 }
 0xee2   :  { %v1416_v23 = vpop.permute.xlu0 %1415 }
 0xee3   :  { %v1418_v24 = vmul.f32 %v2609_v46, %v1416_v23 }
 0xee5   :  { %1420 = vrot.lane.b32.xlu0 %v1418_v24, %s2683_s2 }
 0xf39   :  { %v1321_v26 = vpop.permute.xlu1 %1320 }
 0xf3a   :  { %v3138_v27 = vadd.f32 %v1321_v26, %v1313_v25 }
 0xf3c   :  { %2610 = vtanh.f32 %v3138_v27 }
 0xf49   :  { %v2611_v28 = vpop.eup %2610 }
 0xf4a   :  { %1326 = vrot.lane.b32.xlu1 %v2611_v28, %s2682_s0 }
 0xf57   :  { %v1421_v54 = vpop.permute.xlu0 %1420 }
 0xf58   :  { %v3143_v32 = vadd.f32 %v1421_v54, %v1413_v30 }
 0xf5a   :  { %2612 = vtanh.f32 %v3143_v32 }
 0xf67   :  { %v2613_v33 = vpop.eup %2612 }
 0xf68   :  { %1426 = vrot.lane.b32.xlu0 %v2613_v33, %s2682_s0 }
 0xfbc   :  { %v1327_v34 = vpop.permute.xlu1 %1326 }
 0xfbd   :  { %v3147_v35 = vmul.f32 %v2605_v59, %v1327_v34 }
 0xfbf   :  { %1433 = vrot.lane.b32.xlu1 %v3147_v35, %s2683_s2 }
 0xfda   :  { %v1427_v52 = vpop.permute.xlu0 %1426 }
 0xfdb   :  { %v3151_v37 = vmul.f32 %v2609_v46, %v1427_v52 }
 0xfdd   :  { %1533 = vrot.lane.b32.xlu0 %v3151_v37, %s2683_s2 }
0x1031   :  { %v1434_v38 = vpop.permute.xlu1 %1433 }
0x1032   :  { %2457 = vmatmul.mubr.msk.f32.vlgmr.msra.gmra.mxu0 %vm226_vm3, %v1434_v38 }
0x1033   :  { %2471 = vmatpush3.msra.mxu0 %v2654_v39  ;;  %2478 = vmatprep.mubr.msk.f32.mxu0 %vm2681_vm2, %v2680_v5 }
0x1034   :  { %2472 = vmatprep.subr.mxu0 %v2680_v5 }
0x1035   :  { %2473 = vmatpush3.msra.mxu0 %v2655_v49 }
0x1036   :  { %2474 = vmatprep.subr.mxu0 %v2680_v5 }
0x1037   :  { %2475 = vmatpush3.msra.mxu0 %v2656_v41 }
0x1038   :  { %2476 = vmatprep.subr.mxu0 %v2680_v5 }
0x1039   :  { %2477 = vmatpush3.msra.mxu0 %v2657_v47 }
0x104f   :  { %v1534_v48 = vpop.permute.xlu0 %1533 }
0x1050   :  { %2468 = vmatmul.mubr.msk.f32.vlgmr.msra.gmra.mxu1 %vm226_vm3, %v1534_v48 }
0x1051   :  { %2482 = vmatpush3.msra.mxu1 %v2791_v15  ;;  %2489 = vmatprep.mubr.msk.f32.mxu1 %vm2681_vm2, %v2680_v5 }
0x1052   :  { %2483 = vmatprep.subr.mxu1 %v2680_v5 }
0x1053   :  { %2484 = vmatpush3.msra.mxu1 %v2799_v16 }
0x1054   :  { %2485 = vmatprep.subr.mxu1 %v2680_v5 }
0x1055   :  { %2486 = vmatpush3.msra.mxu1 %v2813_v18 }
0x1056   :  { %2487 = vmatprep.subr.mxu1 %v2680_v5 }
0x1057   :  { %2488 = vmatpush3.msra.mxu1 %v2821_v19 }
0x10f2   :  { %v1503_v50 = vpop.f32.mrf.mxu0 }
0x10f3   :  { %v1507_v57 = vadd.f32 %v1503_v50, %v2900_v63 }
0x10f4   :  { %v2458_v51 = vpop.f32.mrf.mxu0 }
0x10f5   :  { %2614 = vtanh.f32 %v1507_v57  ;;  %v2157_v18 = vmul.f32 -1.442695, %v1507_v57 }
0x1102   :  { %v2615_v15 = vpop.eup %2614 }
0x1103   :  { %1517 = vrot.lane.b32.xlu1 %v2615_v15, %s2682_s0 }
0x1110   :  { %v1603_v53 = vpop.f32.mrf.mxu1 }
0x1111   :  { %v1607_v55 = vadd.f32 %v1603_v53, %v2881_v42 }
0x1112   :  { %v2469_v16 = vpop.f32.mrf.mxu1 }
0x1113   :  { %2616 = vtanh.f32 %v1607_v55  ;;  %v2159_v60 = vmul.f32 -1.442695, %v1607_v55  ;;  %v1910_v55 = vld [vmem:[%s3462_s5 + $0xf8] sm:$0xff] }
0x1114   :  { %2618 = vpow2.f32 %v2157_v18  ;;  %v1894_v16 = vld [vmem:[%s3462_s5 + $0x78] sm:$0xff]  ;;  %2246 = vmatprep.subr.mxu0 %v1910_v55  ;;  %v1893_v18 = vld [vmem:[%s3462_s5 + $0x70] sm:$0xff]  ;;  %v1919_v55 = vld [vmem:[%s3462_s5 + $0x140] sm:$0xff] }
0x1120   :  { %v2617_v44 = vpop.eup %2616 }
0x1121   :  { %1617 = vrot.lane.b32.xlu0 %v2617_v44, %s2682_s0  ;;  %v2619_v5 = vpop.eup %2618  ;;  %v1909_v44 = vld [vmem:[%s3462_s5 + $0xf0] sm:$0xff] }
0x1122   :  { %v1511_v19 = vadd.f32 1.0, %v2619_v5  ;;  %v1908_v5 = vld [vmem:[%s3462_s5 + $0xe8] sm:$0xff] }
0x1124   :  { %2620 = vrcp.f32 %v1511_v19  ;;  %v1892_v19 = vld [vmem:[%s3462_s5 + $0x68] sm:$0xff] }
0x1125   :  { %2622 = vpow2.f32 %v2159_v60  ;;  %v1907_v60 = vld [vmem:[%s3462_s5 + $0xe0] sm:$0xff] }
0x1131   :  { %v2621_v63 = vpop.eup %2620 }
0x1132   :  { %v2623_v11 = vpop.eup %2622  ;;  %v1515_v0 = vmul.f32 %v2621_v63, %v3138_v27 }
0x1133   :  { %v1611_v13 = vadd.f32 1.0, %v2623_v11 }
0x1135   :  { %2624 = vrcp.f32 %v1611_v13  ;;  %v1905_v13 = vld [vmem:[%s3462_s5 + $0xd0] sm:$0xff] }
0x1142   :  { %v2625_v42 = vpop.eup %2624 }
0x1143   :  { %v1615_v9 = vmul.f32 %v2625_v42, %v3143_v32 }
0x1175   :  { %v1518_v4 = vpop.permute.xlu1 %1517 }
0x1176   :  { %v1520_v7 = vmul.f32 %v2621_v63, %v1518_v4  ;;  %v1906_v4 = vld [vmem:[%s3462_s5 + $0xd8] sm:$0xff] }
0x1178   :  { %1522 = vrot.lane.b32.xlu1 %v1520_v7, %s2683_s2  ;;  %v1890_v7 = vld [vmem:[%s3462_s5 + $0x58] sm:$0xff] }
0x1193   :  { %v1618_v62 = vpop.permute.xlu0 %1617 }
0x1194   :  { %v1620_v61 = vmul.f32 %v2625_v42, %v1618_v62  ;;  %v1904_v62 = vld [vmem:[%s3462_s5 + $0xc8] sm:$0xff] }
0x1196   :  { %1622 = vrot.lane.b32.xlu0 %v1620_v61, %s2683_s2 }
0x11ea   :  { %v1523_v2 = vpop.permute.xlu1 %1522 }
0x11eb   :  { %v1525_v40 = vadd.f32 %v1523_v2, %v1515_v0  ;;  %v1888_v0 = vld [vmem:[%s3462_s5 + $0x48] sm:$0xff]  ;;  %v1903_v2 = vld [vmem:[%s3462_s5 + $0xc0] sm:$0xff] }
0x11ed   :  { %2626 = vtanh.f32 %v1525_v40 }
0x11fa   :  { %v2627_v8 = vpop.eup %2626 }
0x11fb   :  { %1528 = vrot.lane.b32.xlu1 %v2627_v8, %s2682_s0  ;;  %v1886_v8 = vld [vmem:[%s3462_s5 + $0x38] sm:$0xff] }
0x1208   :  { %v1623_v12 = vpop.permute.xlu0 %1622 }
0x1209   :  { %v3192_v59 = vadd.f32 %v1623_v12, %v1615_v9  ;;  %v1901_v9 = vld [vmem:[%s3462_s5 + $0xb0] sm:$0xff] }
0x120a   :  { %v1885_v12 = vld [vmem:[%s3462_s5 + $0x30] sm:$0xff] }
0x120b   :  { %2628 = vtanh.f32 %v3192_v59 }
0x1218   :  { %v2629_v1 = vpop.eup %2628 }
0x1219   :  { %1628 = vrot.lane.b32.xlu0 %v2629_v1, %s2682_s0  ;;  %v1900_v1 = vld [vmem:[%s3462_s5 + $0xa8] sm:$0xff] }
0x126d   :  { %v1529_v14 = vpop.permute.xlu1 %1528 }
0x126e   :  { %v3196_v17 = vmul.f32 %v2621_v63, %v1529_v14  ;;  %v1891_v63 = vld [vmem:[%s3462_s5 + $0x60] sm:$0xff]  ;;  %v1884_v14 = vld [vmem:[%s3462_s5 + $0x28] sm:$0xff] }
0x1270   :  { %1635 = vrot.lane.b32.xlu1 %v3196_v17, %s2683_s2  ;;  %v2503_v61 = vpack.i.bf16 %v3009_v20, %v3196_v17  ;;  %v1902_v20 = vld [vmem:[%s3462_s5 + $0xb8] sm:$0xff] }
0x128b   :  { %v1629_v21 = vpop.permute.xlu0 %1628 }
0x128c   :  { %v3200_v46 = vmul.f32 %v2625_v42, %v1629_v21  ;;  %v1889_v42 = vld [vmem:[%s3462_s5 + $0x50] sm:$0xff] }
0x128e   :  { %1735 = vrot.lane.b32.xlu0 %v3200_v46, %s2683_s2 }
0x12e2   :  { %v1636_v23 = vpop.permute.xlu1 %1635 }
0x12e3   :  { %2479 = vmatmul.mubr.msk.f32.vlgmr.msra.gmra.mxu0 %vm226_vm3, %v1636_v23 }
0x12e4   :  { %2247 = vmatpush3.msra.mxu0 %v1894_v16  ;;  %v1934_v16 = vld [vmem:[%s3462_s5 + $0x1b8] sm:$0xff] }
0x12e5   :  { %2248 = vmatprep.subr.mxu0 %v1909_v44  ;;  %v1918_v44 = vld [vmem:[%s3462_s5 + $0x138] sm:$0xff] }
0x12e6   :  { %2249 = vmatpush3.msra.mxu0 %v1893_v18  ;;  %v1933_v18 = vld [vmem:[%s3462_s5 + $0x1b0] sm:$0xff] }
0x12e7   :  { %2250 = vmatprep.subr.mxu0 %v1908_v5  ;;  %v1917_v5 = vld [vmem:[%s3462_s5 + $0x130] sm:$0xff] }
0x12e8   :  { %2251 = vmatpush3.msra.mxu0 %v1892_v19  ;;  %v1932_v19 = vld [vmem:[%s3462_s5 + $0x1a8] sm:$0xff] }
0x12e9   :  { %2252 = vmatprep.subr.mxu0 %v1907_v60  ;;  %v1916_v60 = vld [vmem:[%s3462_s5 + $0x128] sm:$0xff] }
0x12ea   :  { %2253 = vmatpush3.msra.mxu0 %v1891_v63  ;;  %v1931_v63 = vld [vmem:[%s3462_s5 + $0x1a0] sm:$0xff] }
0x12eb   :  { %2254 = vmatprep.subr.mxu0 %v1906_v4  ;;  %v1915_v4 = vld [vmem:[%s3462_s5 + $0x120] sm:$0xff] }
0x12ec   :  { %2255 = vmatpush3.msra.mxu0 %v1890_v7  ;;  %v1930_v7 = vld [vmem:[%s3462_s5 + $0x198] sm:$0xff] }
0x12ed   :  { %2256 = vmatprep.subr.mxu0 %v1905_v13  ;;  %v1929_v13 = vld [vmem:[%s3462_s5 + $0x190] sm:$0xff] }
0x12ee   :  { %2257 = vmatpush3.msra.mxu0 %v1889_v42  ;;  %v1913_v42 = vld [vmem:[%s3462_s5 + $0x110] sm:$0xff] }
0x12ef   :  { %2258 = vmatprep.subr.mxu0 %v1904_v62  ;;  %v1928_v62 = vld [vmem:[%s3462_s5 + $0x188] sm:$0xff] }
0x12f0   :  { %2259 = vmatpush3.msra.mxu0 %v1888_v0  ;;  %v1927_v0 = vld [vmem:[%s3462_s5 + $0x180] sm:$0xff] }
0x12f1   :  { %2260 = vmatprep.subr.mxu0 %v1903_v2  ;;  %v1911_v2 = vld [vmem:[%s3462_s5 + $0x100] sm:$0xff] }
0x1300   :  { %v1736_v24 = vpop.permute.xlu0 %1735 }
0x1301   :  { %2490 = vmatmul.mubr.msk.f32.vlgmr.msra.gmra.mxu1 %vm226_vm3, %v1736_v24  ;;  %v1899_v24 = vld [vmem:[%s3462_s5 + $0xa0] sm:$0xff] }
0x13a3   :  { %v1705_v25 = vpop.f32.mrf.mxu0 }
0x13a4   :  { %v1709_v26 = vadd.f32 %v1705_v25, %v2904_v3  ;;  %v1883_v25 = vld [vmem:[%s3462_s5 + $0x20] sm:$0xff] }
0x13a5   :  { %v2480_v27 = vpop.f32.mrf.mxu0 }
0x13a6   :  { %2630 = vtanh.f32 %v1709_v26  ;;  %v2161_v34 = vmul.f32 -1.442695, %v1709_v26  ;;  %v1898_v26 = vld [vmem:[%s3462_s5 + $0x98] sm:$0xff]  ;;  %v1897_v27 = vld [vmem:[%s3462_s5 + $0x90] sm:$0xff] }
0x13b3   :  { %v2631_v28 = vpop.eup %2630 }
0x13b4   :  { %1719 = vrot.lane.b32.xlu1 %v2631_v28, %s2682_s0  ;;  %v1881_v28 = vld [vmem:[%s3462_s5 + $0x10] sm:$0xff] }
0x13c1   :  { %v1805_v30 = vpop.f32.mrf.mxu1 }
0x13c2   :  { %v1809_v54 = vadd.f32 %v1805_v30, %v2877_v36  ;;  %v1896_v30 = vld [vmem:[%s3462_s5 + $0x88] sm:$0xff] }
0x13c3   :  { %v2491_v32 = vpop.f32.mrf.mxu1 }
0x13c4   :  { %2632 = vtanh.f32 %v1809_v54  ;;  %v2163_v39 = vmul.f32 -1.442695, %v1809_v54  ;;  %v1880_v54 = vld [vmem:[%s3462_s5 + $0x8] sm:$0xff]  ;;  %v1895_v32 = vld [vmem:[%s3462_s5 + $0x80] sm:$0xff] }
0x13c5   :  { %2634 = vpow2.f32 %v2161_v34 }
0x13d1   :  { %v2633_v33 = vpop.eup %2632 }
0x13d2   :  { %1819 = vrot.lane.b32.xlu0 %v2633_v33, %s2682_s0  ;;  %v2635_v52 = vpop.eup %2634  ;;  %v1879_v33 = vld [vmem:[%s3462_s5] sm:$0xff] }
0x13d3   :  { %v1713_v38 = vadd.f32 1.0, %v2635_v52  ;;  %v2498_v52 = vpack.i.bf16 %v2963_v29, %v3147_v35  ;;  %v1940_v29 = vld [vmem:[%s3462_s5 + $0x1e8] sm:$0xff]  ;;  %v2508_v35 = vpack.i.bf16 %v3200_v46, %v3013_v22  ;;  %v1938_v22 = vld [vmem:[%s3462_s5 + $0x1d8] sm:$0xff]  ;;  %v2513_v46 = vpack.i.bf16 %v3151_v37, %v2967_v31 }
0x13d4   :  { %v1936_v31 = vld [vmem:[%s3462_s5 + $0x1c8] sm:$0xff] }
0x13d5   :  { %2636 = vrcp.f32 %v1713_v38  ;;  %v1942_v38 = vld [vmem:[%s3462_s5 + $0x1f8] sm:$0xff]  ;;  %v1920_v37 = vld [vmem:[%s3462_s5 + $0x148] sm:$0xff] }
0x13d6   :  { %2638 = vpow2.f32 %v2163_v39  ;;  %v1926_v39 = vld [vmem:[%s3462_s5 + $0x178] sm:$0xff]  ;;  %2281 = vmatprep.subr.mxu1 %v1942_v38 }
0x13d7   :  { %2282 = vmatpush3.msra.mxu1 %v1926_v39 }
0x13e2   :  { %v3210_v3 = vpop.eup %2636 }
0x13e3   :  { %v2639_v36 = vpop.eup %2638  ;;  %v1717_v51 = vmul.f32 %v3210_v3, %v1525_v40  ;;  %v1887_v40 = vld [vmem:[%s3462_s5 + $0x40] sm:$0xff] }
0x13e4   :  { %v1813_v47 = vadd.f32 1.0, %v2639_v36  ;;  %2261 = vmatpush3.msra.mxu0 %v1887_v40  ;;  %v1924_v36 = vld [vmem:[%s3462_s5 + $0x168] sm:$0xff] }
0x13e5   :  { %2262 = vmatprep.subr.mxu0 %v1902_v20 }
0x13e6   :  { %2640 = vrcp.f32 %v1813_v47  ;;  %2263 = vmatpush3.msra.mxu0 %v1886_v8  ;;  %v1939_v47 = vld [vmem:[%s3462_s5 + $0x1e0] sm:$0xff] }
0x13e7   :  { %2264 = vmatprep.subr.mxu0 %v1901_v9 }
0x13e8   :  { %2265 = vmatpush3.msra.mxu0 %v1885_v12 }
0x13e9   :  { %2266 = vmatprep.subr.mxu0 %v1900_v1 }
0x13ea   :  { %2267 = vmatpush3.msra.mxu0 %v1884_v14 }
0x13eb   :  { %2268 = vmatprep.subr.mxu0 %v1899_v24 }
0x13ec   :  { %2269 = vmatpush3.msra.mxu0 %v1883_v25 }
0x13ed   :  { %2270 = vmatprep.subr.mxu0 %v1898_v26 }
0x13f3   :  { %v3214_v48 = vpop.eup %2640 }
0x13f4   :  { %v1817_v17 = vmul.f32 %v3214_v48, %v3192_v59  ;;  %v1882_v59 = vld [vmem:[%s3462_s5 + $0x18] sm:$0xff] }
0x13f5   :  { %2271 = vmatpush3.msra.mxu0 %v1882_v59 }
0x13f6   :  { %2272 = vmatprep.subr.mxu0 %v1897_v27 }
0x13f7   :  { %2273 = vmatpush3.msra.mxu0 %v1881_v28 }
0x13f8   :  { %2274 = vmatprep.subr.mxu0 %v1896_v30 }
0x13f9   :  { %2275 = vmatpush3.msra.mxu0 %v1880_v54 }
0x13fa   :  { %2276 = vmatprep.subr.mxu0 %v1895_v32 }
0x13fb   :  { %2277 = vmatpush3.msra.mxu0 %v1879_v33 }
0x1426   :  { %v1720_v49 = vpop.permute.xlu1 %1719 }
0x1427   :  { %v1722_v41 = vmul.f32 %v3210_v3, %v1720_v49  ;;  %v1941_v49 = vld [vmem:[%s3462_s5 + $0x1f0] sm:$0xff] }
0x1428   :  { %2283 = vmatprep.subr.mxu1 %v1941_v49 }
0x1429   :  { %1724 = vrot.lane.b32.xlu1 %v1722_v41, %s2683_s2  ;;  %v1925_v41 = vld [vmem:[%s3462_s5 + $0x170] sm:$0xff] }
0x142a   :  { %2284 = vmatpush3.msra.mxu1 %v1925_v41 }
0x142b   :  { %2285 = vmatprep.subr.mxu1 %v1940_v29  ;;  %v2164_v29 = vld [vmem:[%s3463_s6] ss:$0 sm:$0xff]  ;;  %s2685_s6 = smov [#allocation3]  }
0x142c   :  { %2286 = vmatpush3.msra.mxu1 %v1924_v36  ;;  %s2116_s8 = sshll.u32 %s2685_s6, 4  ;;  %s2117_s8 = int_to_ptr.vmem [resolvable:$true] %s2116_s8 }
0x142d   :  { %2287 = vmatprep.subr.mxu1 %v1939_v47  ;;  %s2658_s9 = scalar_lea.vmem %s2117_s8, 128  ;;  %p2663_p1 = scmp.lt.s32.totalorder %s2117_s8, %s2117_s8 }
0x142e   :  { %p2659_p0 = scmp.ne.s32.totalorder %s2117_s8, %s2658_s9  ;;  %p2664_p2 = scmp.lt.s32.totalorder %s2658_s9, %s2658_s9 }
0x1430   :  { %p2665_p3 = por %p2664_p2, %p2663_p1 }
0x1432   :  { %p2666_p4 = pnand %p2665_p3, %p2659_p0 }
0x1444   :  { %v1820_v50 = vpop.permute.xlu0 %1819 }
0x1445   :  { %v1822_v57 = vmul.f32 %v3214_v48, %v1820_v50  ;;  %v1923_v50 = vld [vmem:[%s3462_s5 + $0x160] sm:$0xff] }
0x1446   :  { %2288 = vmatpush3.msra.mxu1 %v1923_v50 }
0x1447   :  { %1824 = vrot.lane.b32.xlu0 %v1822_v57, %s2683_s2  ;;  %v1922_v57 = vld [vmem:[%s3462_s5 + $0x158] sm:$0xff]  ;;  %2289 = vmatprep.subr.mxu1 %v1938_v22 }
0x1448   :  { %2290 = vmatpush3.msra.mxu1 %v1922_v57 }
0x149b   :  { %v1725_v15 = vpop.permute.xlu1 %1724 }
0x149c   :  { %v1727_v53 = vadd.f32 %v1725_v15, %v1717_v51  ;;  %v1937_v51 = vld [vmem:[%s3462_s5 + $0x1d0] sm:$0xff] }
0x149d   :  { %v1921_v15 = vld [vmem:[%s3462_s5 + $0x150] sm:$0xff]  ;;  %2291 = vmatprep.subr.mxu1 %v1937_v51 }
0x149e   :  { %2642 = vtanh.f32 %v1727_v53  ;;  %2292 = vmatpush3.msra.mxu1 %v1921_v15  ;;  %v1935_v53 = vld [vmem:[%s3462_s5 + $0x1c0] sm:$0xff] }
0x149f   :  { %2293 = vmatprep.subr.mxu1 %v1936_v31 }
0x14a0   :  { %2294 = vmatpush3.msra.mxu1 %v1920_v37 }
0x14a1   :  { %2295 = vmatprep.subr.mxu1 %v1935_v53 }
0x14a2   :  { %2296 = vmatpush3.msra.mxu1 %v1919_v55 }
0x14a3   :  { %2297 = vmatprep.subr.mxu1 %v1934_v16 }
0x14a4   :  { %2298 = vmatpush3.msra.mxu1 %v1918_v44 }
0x14a5   :  { %2299 = vmatprep.subr.mxu1 %v1933_v18 }
0x14a6   :  { %2300 = vmatpush3.msra.mxu1 %v1917_v5 }
0x14a7   :  { %2301 = vmatprep.subr.mxu1 %v1932_v19 }
0x14a8   :  { %2302 = vmatpush3.msra.mxu1 %v1916_v60 }
0x14a9   :  { %2303 = vmatprep.subr.mxu1 %v1931_v63 }
0x14aa   :  { %2304 = vmatpush3.msra.mxu1 %v1915_v4 }
0x14ab   :  { %v2643_v11 = vpop.eup %2642  ;;  %2305 = vmatprep.subr.mxu1 %v1930_v7 }
0x14ac   :  { %1730 = vrot.lane.b32.xlu1 %v2643_v11, %s2682_s0  ;;  %v1914_v11 = vld [vmem:[%s3462_s5 + $0x118] sm:$0xff] }
0x14ad   :  { %2306 = vmatpush3.msra.mxu1 %v1914_v11 }
0x14ae   :  { %2307 = vmatprep.subr.mxu1 %v1929_v13 }
0x14af   :  { %2308 = vmatpush3.msra.mxu1 %v1913_v42 }
0x14b0   :  { %2504 = vrot.lane.b32.xlu1 %v2503_v61, %s2684_s13  ;;  %2309 = vmatprep.subr.mxu1 %v1928_v62  ;;  %v1912_v61 = vld [vmem:[%s3462_s5 + $0x108] sm:$0xff] }
0x14b1   :  { %2310 = vmatpush3.msra.mxu1 %v1912_v61 }
0x14b2   :  { %2311 = vmatprep.subr.mxu1 %v1927_v0 }
0x14b3   :  { %2312 = vmatpush3.msra.mxu1 %v1911_v2 }
0x14b9   :  { %v1825_v21 = vpop.permute.xlu0 %1824 }
0x14ba   :  { %v1827_v23 = vadd.f32 %v1825_v21, %v1817_v17 }
0x14bc   :  { %2644 = vtanh.f32 %v1827_v23 }
0x14c9   :  { %v2645_v34 = vpop.eup %2644 }
0x14ca   :  { %1830 = vrot.lane.b32.xlu0 %v2645_v34, %s2682_s0 }
0x14ce   :  { %2499 = vrot.lane.b32.xlu0 %v2498_v52, %s2682_s0 }
0x14d2   :  { %2509 = vrot.lane.b32.xlu0 %v2508_v35, %s2682_s0 }
0x14d6   :  { %2514 = vrot.lane.b32.xlu0 %v2513_v46, %s2684_s13 }
0x151e   :  { %v1731_v40 = vpop.permute.xlu1 %1730 }
0x151f   :  { %v1733_v23 = vmul.f32 %v3210_v3, %v1731_v40 }
0x1522   :  { %v2505_v9 = vpop.permute.xlu1 %2504 }
0x1523   :  { %v2507_v17 = vunpack.i.h.bf16 %v2505_v9  ;;  %v2506_v21 = vunpack.i.l.bf16 %v2505_v9 }
0x153c   :  { %v1831_v20 = vpop.permute.xlu0 %1830 }
0x153d   :  { %v1833_v8 = vmul.f32 %v3214_v48, %v1831_v20 }
0x153f   :  { %1849 = vrot.lane.b32.xlu1 %v1833_v8, %s2683_s2 }
0x1540   :  { %v2500_v12 = vpop.permute.xlu0 %2499 }
0x1541   :  { %v2502_v1 = vunpack.i.h.bf16 %v2500_v12  ;;  %v2501_v14 = vunpack.i.l.bf16 %v2500_v12 }
0x1543   :  { %v1865_v24 = vsel %vm226_vm3, %v2922_v45, %v2502_v1  ;;  %v1870_v25 = vsel %vm226_vm3, %v3106_v58, %v2501_v14 }
0x1544   :  { %v2510_v26 = vpop.permute.xlu0 %2509  ;;  %v1871_v48 = vsel %vm1866_vm4, %v1870_v25, %v2506_v21  ;;  %v1867_v59 = vsel %vm1866_vm4, %v1865_v24, %v2507_v17 }
0x1545   :  { %v1872_v27 = vsel %vm1868_vm5, %v1871_v48, %v1733_v23  ;;  %v1869_v28 = vsel %vm1868_vm5, %v1867_v59, %v3055_v6  ;;  %v2511_v30 = vunpack.i.l.bf16 %v2510_v26  ;;  %v2512_v33 = vunpack.i.h.bf16 %v2510_v26 }
0x1546   :  { %2014 = vmatprep.mubr.f32.mxu0 %v1872_v27 }
0x1547   :  { %2015 = vmatmul.mubr.f32.vlgmr.msra.gmra.mxu0 %v1869_v28  ;;  %v1876_v45 = vsel %vm226_vm3, %v3071_v10, %v2511_v30 }
0x1548   :  { %v2515_v3 = vpop.permute.xlu0 %2514 }
0x1549   :  { %v2516_v54 = vunpack.i.l.bf16 %v2515_v3  ;;  %v2517_v34 = vunpack.i.h.bf16 %v2515_v3 }
0x154b   :  { %v1877_v58 = vsel %vm1866_vm4, %v1876_v45, %v2516_v54 }
0x154c   :  { %v1878_v32 = vsel %vm1868_vm5, %v1877_v58, %v2918_v43 }
0x154d   :  { %2084 = vmatprep.mubr.f32.mxu1 %v1878_v32 }
0x15b1   :  { %v1850_v52 = vpop.permute.xlu1 %1849 }
0x15b2   :  { %v1873_v38 = vsel %vm226_vm3, %v1850_v52, %v2512_v33 }
0x15b3   :  { %v1874_v6 = vsel %vm1866_vm4, %v1873_v38, %v2517_v34 }
0x15b4   :  { %v1875_v39 = vsel %vm1868_vm5, %v1874_v6, %v3102_v56 }
0x15b5   :  { %2085 = vmatmul.mubr.f32.vlgmr.msra.gmra.mxu1 %v1875_v39 }
0x1607   :  { %v2278_v49 = vpop.f32.mrf.mxu0 }
0x1609   :  { %v2279_v41 = vpop.f32.mrf.mxu0 }
0x160a   :  { %v2280_v10 = vadd.f32 %v2279_v41, %v2278_v49 }
0x160c   :  { %v2017_v36 = vadd.f32 %v2280_v10, %v2164_v29 }
0x1675   :  { %v2313_v43 = vpop.f32.mrf.mxu1 }
0x1677   :  { %v2314_v35 = vpop.f32.mrf.mxu1 }
0x1678   :  { %v2315_v47 = vadd.f32 %v2314_v35, %v2313_v43 }
0x167a   :  { %v2087_v50 = vadd.f32 %v2315_v47, %v2017_v36 }
0x167c   :  { %v2090_v22 = vsel %vm55_vm1, %v2087_v50, -inf  ;;  %v2165_v31 = vmul.f32 -1.442695, %v2087_v50 }
0x167d   :  { %2091 = vmax.xlane.f32.xlu1 %v2090_v22 }
0x1706   :  { %v2092_v46 = vpop.xlane.xlu1 %2091 }
0x1707   :  { %v2093_v57 = vsub.f32 %v2087_v50, %v2092_v46 }
0x1709   :  { %v2094_v51 = vmul.f32 1.442695, %v2093_v57 }
0x170b   :  { %2646 = vpow2.f32 %v2094_v51 }
0x170c   :  { %2648 = vpow2.f32 %v2165_v31 }
0x1718   :  { %v2647_v56 = vpop.eup %2646 }
0x1719   :  { %v2096_v15 = vsel %vm55_vm1, %v2647_v56, 0.0  ;;  %v2649_v37 = vpop.eup %2648 }
0x171a   :  { %2097 = vadd.xlane.f32.xlu0 %v2096_v15  ;;  %v2104_v53 = vadd.f32 1.0, %v2649_v37 }
0x17a3   :  { %v2098_v55 = vpop.xlane.xlu0 %2097 }
0x17a4   :  { %2650 = vrcp.f32 %v2098_v55 }
0x17a5   :  { %2652 = vrcp.f32 %v2104_v53 }
0x17b1   :  { %v2651_v16 = vpop.eup %2650 }
0x17b2   :  { %v2100_v44 = vmul.f32 %v2651_v16, %v2647_v56  ;;  %v2653_v18 = vpop.eup %2652 }
0x17b4   :  { %v2107_v5 = vsel %vm55_vm1, %v2100_v44, %v2653_v18 }
0x17b5   :  { %2109 = vst.msk [vmem:[#allocation3] sm:$0xff] %vm2108_vm6, %v2107_v5 }
0x17b6   :  { %2669 = shalt.err (!%p2666_p4)
}
0x17b7   :  { %2119 = dma.vmem_to_hbm [thread:$0]  %s2117_s8, 128, %s3464_s7, [#allocation4]  }
0x17b8   :  { %2678 = dma.done.wait [#allocation4], 128  }
0x17b9   :  { %2679 = vsyncadd [#allocation4], 4294967168 }
0x17ba   :  { %2123 = vsyncpa [#allocation4], 1 }

</bundles_post_ra>
